<compile_context>
chip_gen: v7x
topology: tpu7x:2x2x1
jax: 0.10.0
libtpu: 0.0.40
codegen_flags: <defaults>
</compile_context>

<pallas_src>
import functools

import jax
import jax.numpy as jnp
from jax.experimental import pallas as pl
from jax.experimental.pallas import tpu as pltpu


def _round_up(x, m):
    return ((x + m - 1) // m) * m


def _decoder_kernel(
    ids_ref,                 # (Bp,)  int32, SMEM (scalar prefetch)
    emb_hbm,                 # (V, Hp) f32, HBM (manual row gather)
    h0_ref, c0_ref,          # (Bp, Hp) f32, VMEM, resident
    wg_ref,                  # (2Hp, 4Hp) bf16, VMEM, resident (fused [W_ih^T; W_hh^T])
    bg_ref,                  # (1, 4Hp) f32, VMEM, resident
    wout_ref,                # (Hp, TILE_V) bf16, VMEM, tile j
    bout_ref,                # (1, TILE_V) f32, VMEM, tile j
    logp_ref,                # (Bp, Vp) f32 out, resident (normalized in place)
    hout_ref, cout_ref,      # (Bp, Hp) f32 out, resident
    x_scr,                   # (Bp, Hp) f32 scratch: gathered embeddings
    hb_scr,                  # (Bp, Hp) bf16 scratch: new hidden state for MXU
    m_scr, l_scr,            # (Bp, 1) f32 scratch: running max / sum-exp
    sem,                     # (Bp,) DMA semaphores
    *, hp, tile_v, batch):
    j = pl.program_id(0)          # vocab tile index
    nv = pl.num_programs(0)

    @pl.when(j == 0)
    def _lstm_step():
        # Gather the B embedding rows straight from HBM (ids live in SMEM).
        copies = []
        for b in range(batch):
            cp = pltpu.make_async_copy(
                emb_hbm.at[pl.ds(ids_ref[b], 1), :],
                x_scr.at[pl.ds(b, 1), :],
                sem.at[b])
            cp.start()
            copies.append(cp)
        for cp in copies:
            cp.wait()

        x = jnp.maximum(x_scr[...], 0.0)                       # ReLU (fp32)
        # Fused gate matmul: one MXU push with K = 2*Hp, bf16 in / fp32 acc.
        xh = jnp.concatenate([x, h0_ref[...]], axis=-1).astype(jnp.bfloat16)
        gates = (jnp.dot(xh, wg_ref[...], preferred_element_type=jnp.float32)
                 + bg_ref[...])                                # (Bp, 4Hp) fp32

        i_g = jax.nn.sigmoid(gates[:, 0 * hp:1 * hp])
        f_g = jax.nn.sigmoid(gates[:, 1 * hp:2 * hp])
        g_g = jnp.tanh(gates[:, 2 * hp:3 * hp])
        o_g = jax.nn.sigmoid(gates[:, 3 * hp:4 * hp])

        c_new = f_g * c0_ref[...] + i_g * g_g
        h_new = o_g * jnp.tanh(c_new)
        hout_ref[...] = h_new
        cout_ref[...] = c_new
        hb_scr[...] = h_new.astype(jnp.bfloat16)               # cast once for MXU

        m_scr[...] = jnp.full((batch, 1), -jnp.inf, jnp.float32)
        l_scr[...] = jnp.zeros((batch, 1), jnp.float32)

    # Output projection for this vocab tile; raw logits go straight into the
    # resident output block (lane-aligned dynamic store) + online lse update.
    logits = (jnp.dot(hb_scr[...], wout_ref[...],
                      preferred_element_type=jnp.float32)
              + bout_ref[...])                                 # (Bp, TILE_V)
    col = pl.multiple_of(j * tile_v, tile_v)
    logp_ref[:, pl.ds(col, tile_v)] = logits

    m_prev = m_scr[...]
    m_new = jnp.maximum(m_prev, jnp.max(logits, axis=-1, keepdims=True))
    l_scr[...] = (l_scr[...] * jnp.exp(m_prev - m_new)
                  + jnp.sum(jnp.exp(logits - m_new), axis=-1, keepdims=True))
    m_scr[...] = m_new

    @pl.when(j == nv - 1)
    def _normalize():
        norm = m_scr[...] + jnp.log(l_scr[...])                # (Bp, 1)
        logp_ref[...] = logp_ref[...] - norm                   # log-softmax


def simple_decoder_rnn_forward(params, input_ids, hidden):
    """JAX/Pallas equivalent of simpleDecoderRNN.forward.

    input_ids : integer array, any shape; flattened to (B,) like view(-1, 1).
    hidden    : tuple (h0, c0), each (1, B, H)  (PyTorch LSTM convention).
    returns   : (log_probs (B, V), (h1, c1) each (1, B, H))
    """
    h0, c0 = hidden
    H, V = params["H"], params["V"]
    Hp, Vp, tile_v = params["H_pad"], params["V_pad"], params["tile_v"]

    ids = input_ids.reshape(-1).astype(jnp.int32)
    B = ids.shape[0]
    Bp = max(8, _round_up(B, 8))                 # sublane-aligned batch
    nv = Vp // tile_v

    ids_p = jnp.zeros((Bp,), jnp.int32).at[:B].set(ids)
    h0_p = jnp.zeros((Bp, Hp), jnp.float32).at[:B, :H].set(
        h0.reshape(B, H).astype(jnp.float32))
    c0_p = jnp.zeros((Bp, Hp), jnp.float32).at[:B, :H].set(
        c0.reshape(B, H).astype(jnp.float32))

    kernel = functools.partial(_decoder_kernel, hp=Hp, tile_v=tile_v, batch=Bp)

    resident = lambda j, ids: (0, 0)             # fetched once, stays in VMEM
    vtile = lambda j, ids: (0, j)                # stream W_out / b_out tiles

    grid_spec = pltpu.PrefetchScalarGridSpec(
        num_scalar_prefetch=1,
        grid=(nv,),
        in_specs=[
            pl.BlockSpec(memory_space=pl.ANY),            # embedding table (HBM)
            pl.BlockSpec((Bp, Hp), resident),             # h0
            pl.BlockSpec((Bp, Hp), resident),             # c0
            pl.BlockSpec((2 * Hp, 4 * Hp), resident),     # fused gate weights (bf16)
            pl.BlockSpec((1, 4 * Hp), resident),          # gate bias
            pl.BlockSpec((Hp, tile_v), vtile),            # W_out tile (bf16)
            pl.BlockSpec((1, tile_v), vtile),             # b_out tile
        ],
        out_specs=(
            pl.BlockSpec((Bp, Vp), resident),             # log-probs (resident)
            pl.BlockSpec((Bp, Hp), resident),             # h1
            pl.BlockSpec((Bp, Hp), resident),             # c1
        ),
        scratch_shapes=[
            pltpu.VMEM((Bp, Hp), jnp.float32),            # gathered embeddings
            pltpu.VMEM((Bp, Hp), jnp.bfloat16),           # h_new (bf16, cast once)
            pltpu.VMEM((Bp, 1), jnp.float32),             # running max
            pltpu.VMEM((Bp, 1), jnp.float32),             # running sum-exp
            pltpu.SemaphoreType.DMA((Bp,)),
        ],
    )

    # TODO(synk): alias (h0, c0) -> (h1, c1) via input_output_aliases and fold a
    # token-generation loop into an extra time grid axis so the weights stay
    # VMEM-resident across decode steps (left out to keep the single-step
    # forward interface of the PyTorch module).
    logp_p, h1_p, c1_p = pl.pallas_call(
        kernel,
        out_shape=(
            jax.ShapeDtypeStruct((Bp, Vp), jnp.float32),
            jax.ShapeDtypeStruct((Bp, Hp), jnp.float32),
            jax.ShapeDtypeStruct((Bp, Hp), jnp.float32),
        ),
        grid_spec=grid_spec,
        compiler_params=pltpu.CompilerParams(
            dimension_semantics=("arbitrary",),
            vmem_limit_bytes=48 * 1024 * 1024,
        ),
    )(ids_p, params["embedding"], h0_p, c0_p,
      params["W_gates"], params["b_gates"], params["W_out"], params["b_out"])

    logp = logp_p[:B, :V]
    h1 = h1_p[:B, :H][None, ...]
    c1 = c1_p[:B, :H][None, ...]
    return logp, (h1, c1)


def init_params(key, hidden_size, output_size, tile_v=None):
    """Deterministic init matching the PyTorch module, pre-packed/padded for TPU."""
    H, V = hidden_size, output_size
    k = jax.random.split(key, 7)
    s = 1.0 / (H ** 0.5)
    emb = jax.random.normal(k[0], (V, H), jnp.float32)                # nn.Embedding
    W_ih = jax.random.uniform(k[1], (4 * H, H), jnp.float32, -s, s)   # lstm weight_ih_l0
    W_hh = jax.random.uniform(k[2], (4 * H, H), jnp.float32, -s, s)   # lstm weight_hh_l0
    b_ih = jax.random.uniform(k[3], (4 * H,), jnp.float32, -s, s)
    b_hh = jax.random.uniform(k[4], (4 * H,), jnp.float32, -s, s)
    W_out = jax.random.uniform(k[5], (V, H), jnp.float32, -s, s)      # nn.Linear
    b_out = jax.random.uniform(k[6], (V,), jnp.float32, -s, s)

    Hp = _round_up(H, 128)
    if tile_v is None:
        tile_v = max(256, min(2048, _round_up(V, 256)))
    Vp = _round_up(V, tile_v)

    # Embedding kept fp32 (only B rows gathered per step); columns padded to Hp.
    emb_p = jnp.zeros((V, Hp), jnp.float32).at[:, :H].set(emb)

    # Fused, padded gate weights: rows [x-part ; h-part], columns 4 gate blocks
    # of width Hp in PyTorch order [i, f, g, o]; padded rows/cols are zero.
    Wg = jnp.zeros((2 * Hp, 4 * Hp), jnp.float32)
    bg = jnp.zeros((1, 4 * Hp), jnp.float32)
    b_sum = b_ih + b_hh
    for g in range(4):
        Wg = Wg.at[0:H, g * Hp:g * Hp + H].set(W_ih.T[:, g * H:(g + 1) * H])
        Wg = Wg.at[Hp:Hp + H, g * Hp:g * Hp + H].set(W_hh.T[:, g * H:(g + 1) * H])
        bg = bg.at[0, g * Hp:g * Hp + H].set(b_sum[g * H:(g + 1) * H])
    Wg = Wg.astype(jnp.bfloat16)

    # Output projection, padded; padded vocab columns get -1e30 bias so they
    # contribute nothing to the softmax normalization.
    Wout_p = (jnp.zeros((Hp, Vp), jnp.float32)
              .at[:H, :V].set(W_out.T).astype(jnp.bfloat16))
    bout_p = jnp.full((1, Vp), -1e30, jnp.float32).at[0, :V].set(b_out)

    return {
        "embedding": emb_p,       # (V, Hp)  f32
        "W_gates": Wg,            # (2Hp, 4Hp) bf16
        "b_gates": bg,            # (1, 4Hp) f32
        "W_out": Wout_p,          # (Hp, Vp) bf16
        "b_out": bout_p,          # (1, Vp)  f32
        "H": H, "V": V, "H_pad": Hp, "V_pad": Vp, "tile_v": tile_v,
    }


def _reference_forward(params, input_ids, hidden):
    """Pure-JAX reference (same bf16-quantized weights) for correctness check."""
    h0, c0 = hidden
    H, V, Hp = params["H"], params["V"], params["H_pad"]
    ids = input_ids.reshape(-1)
    B = ids.shape[0]

    x = jnp.maximum(params["embedding"][ids], 0.0)                    # (B, Hp)
    h0f = jnp.zeros((B, Hp), jnp.float32).at[:, :H].set(h0.reshape(B, H))
    c0f = jnp.zeros((B, Hp), jnp.float32).at[:, :H].set(c0.reshape(B, H))

    xh = jnp.concatenate([x, h0f], axis=-1)
    xh = xh.astype(jnp.bfloat16).astype(jnp.float32)                  # match kernel
    gates = xh @ params["W_gates"].astype(jnp.float32) + params["b_gates"]
    i = jax.nn.sigmoid(gates[:, 0 * Hp:1 * Hp])
    f = jax.nn.sigmoid(gates[:, 1 * Hp:2 * Hp])
    g = jnp.tanh(gates[:, 2 * Hp:3 * Hp])
    o = jax.nn.sigmoid(gates[:, 3 * Hp:4 * Hp])
    c1 = f * c0f + i * g
    h1 = o * jnp.tanh(c1)

    h1_q = h1.astype(jnp.bfloat16).astype(jnp.float32)                # match kernel
    logits = h1_q @ params["W_out"].astype(jnp.float32) + params["b_out"]
    logp = jax.nn.log_softmax(logits[:, :V], axis=1)
    return logp, (h1[None, :, :H], c1[None, :, :H])


if __name__ == "__main__":
    hidden_size = 32
    output_size = 300          # > tile_v so the multi-tile / online-lse path runs
    batch = 2

    key = jax.random.PRNGKey(0)
    kp, ki = jax.random.split(key)
    params = init_params(kp, hidden_size, output_size, tile_v=256)

    input_ids = jax.random.randint(ki, (batch,), 0, output_size, dtype=jnp.int32)
    # NOTE: the PyTorch initHidden returns a single zeros tensor, but nn.LSTM
    # requires an (h0, c0) tuple; we use the (h0, c0) convention here.
    h0 = jnp.zeros((1, batch, hidden_size), jnp.float32)
    c0 = jnp.zeros((1, batch, hidden_size), jnp.float32)

    log_probs, (h1, c1) = simple_decoder_rnn_forward(params, input_ids, (h0, c0))
    jax.block_until_ready((log_probs, h1, c1))

    ref_lp, (ref_h, ref_c) = _reference_forward(params, input_ids, (h0, c0))

    assert log_probs.shape == (batch, output_size)
    assert h1.shape == (1, batch, hidden_size) and c1.shape == (1, batch, hidden_size)
    assert jnp.allclose(log_probs, ref_lp, atol=2e-2), \
        float(jnp.max(jnp.abs(log_probs - ref_lp)))
    assert jnp.allclose(h1, ref_h, atol=2e-2)
    assert jnp.allclose(c1, ref_c, atol=2e-2)
    # log-softmax sanity: probabilities over the real vocab sum to 1.
    assert jnp.allclose(jnp.sum(jnp.exp(log_probs), axis=1), 1.0, atol=5e-3)

    print("KERNEL_OK")
</pallas_src>

<mosaic_0001>
module attributes {stable_mosaic.version = 11 : i64} {
  func.func @_decoder_kernel(%arg0: i32, %arg1: memref<8xi32, #tpu.memory_space<smem>>, %arg2: memref<300x128xf32, #tpu.memory_space<any>>, %arg3: memref<8x128xf32, #tpu.memory_space<vmem>>, %arg4: memref<8x128xf32, #tpu.memory_space<vmem>>, %arg5: memref<256x512xbf16, #tpu.memory_space<vmem>>, %arg6: memref<1x512xf32, #tpu.memory_space<vmem>>, %arg7: memref<128x256xbf16, #tpu.memory_space<vmem>>, %arg8: memref<1x256xf32, #tpu.memory_space<vmem>>, %arg9: memref<8x512xf32, #tpu.memory_space<vmem>>, %arg10: memref<8x128xf32, #tpu.memory_space<vmem>>, %arg11: memref<8x128xf32, #tpu.memory_space<vmem>>, %arg12: memref<8x128xf32, #tpu.memory_space<vmem>>, %arg13: memref<8x128xbf16, #tpu.memory_space<vmem>>, %arg14: memref<8x1xf32, #tpu.memory_space<vmem>>, %arg15: memref<8x1xf32, #tpu.memory_space<vmem>>, %arg16: memref<8x!tpu.dma_semaphore, #tpu.memory_space<semaphore_mem>>) attributes {dimension_semantics = [#tpu.dimension_semantics<arbitrary>], iteration_bounds = array<i64: 2>, scalar_prefetch = 1 : i64, scratch_operands = 5 : i64, tpu.core_type = #tpu.core_type<tc>, window_params = [{}, {pipeline_mode = #tpu.pipeline_mode<synchronous>, transform_indices = @transform_1, window_bounds = array<i64: 8, 128>}, {pipeline_mode = #tpu.pipeline_mode<synchronous>, transform_indices = @transform_2, window_bounds = array<i64: 8, 128>}, {pipeline_mode = #tpu.pipeline_mode<synchronous>, transform_indices = @transform_3, window_bounds = array<i64: 256, 512>}, {pipeline_mode = #tpu.pipeline_mode<synchronous>, transform_indices = @transform_4, window_bounds = array<i64: 1, 512>}, {transform_indices = @transform_5, window_bounds = array<i64: 128, 256>}, {transform_indices = @transform_6, window_bounds = array<i64: 1, 256>}, {pipeline_mode = #tpu.pipeline_mode<synchronous>, transform_indices = @transform_7, window_bounds = array<i64: 8, 512>}, {pipeline_mode = #tpu.pipeline_mode<synchronous>, transform_indices = @transform_8, window_bounds = array<i64: 8, 128>}, {pipeline_mode = #tpu.pipeline_mode<synchronous>, transform_indices = @transform_9, window_bounds = array<i64: 8, 128>}]} {
    %c0_i32 = arith.constant 0 : i32
    %0 = arith.cmpi eq, %arg0, %c0_i32 : i32
    %1 = arith.extui %0 : i1 to i32
    %c0_i32_0 = arith.constant 0 : i32
    %2 = arith.cmpi ne, %1, %c0_i32_0 : i32
    scf.if %2 {
      %c0_18 = arith.constant 0 : index
      %32 = memref.load %arg1[%c0_18] : memref<8xi32, #tpu.memory_space<smem>>
      %c0_i32_19 = arith.constant 0 : i32
      %c0_i32_20 = arith.constant 0 : i32
      %33 = tpu.memref_slice %arg2[%32, %c0_i32_20] : memref<300x128xf32, #tpu.memory_space<any>> -> memref<1x128xf32, #tpu.memory_space<any>>
      %c0_i32_21 = arith.constant 0 : i32
      %c0_i32_22 = arith.constant 0 : i32
      %34 = tpu.memref_slice %arg12[%c0_i32_21, %c0_i32_22] : memref<8x128xf32, #tpu.memory_space<vmem>> -> memref<1x128xf32, #tpu.memory_space<vmem>>
      %35 = tpu.memref_slice %arg16[%c0_i32_19] : memref<8x!tpu.dma_semaphore, #tpu.memory_space<semaphore_mem>> -> memref<1x!tpu.dma_semaphore, #tpu.memory_space<semaphore_mem>>
      %36 = tpu.memref_squeeze %35 : memref<1x!tpu.dma_semaphore, #tpu.memory_space<semaphore_mem>> -> memref<!tpu.dma_semaphore, #tpu.memory_space<semaphore_mem>>
      tpu.enqueue_dma source(%33 : memref<1x128xf32, #tpu.memory_space<any>>) target(%34 : memref<1x128xf32, #tpu.memory_space<vmem>>) target_semaphore(%36 : memref<!tpu.dma_semaphore, #tpu.memory_space<semaphore_mem>>)
      %c1 = arith.constant 1 : index
      %37 = memref.load %arg1[%c1] : memref<8xi32, #tpu.memory_space<smem>>
      %c1_i32_23 = arith.constant 1 : i32
      %c0_i32_24 = arith.constant 0 : i32
      %38 = tpu.memref_slice %arg2[%37, %c0_i32_24] : memref<300x128xf32, #tpu.memory_space<any>> -> memref<1x128xf32, #tpu.memory_space<any>>
      %c1_i32_25 = arith.constant 1 : i32
      %c0_i32_26 = arith.constant 0 : i32
      %39 = tpu.memref_slice %arg12[%c1_i32_25, %c0_i32_26] : memref<8x128xf32, #tpu.memory_space<vmem>> -> memref<1x128xf32, #tpu.memory_space<vmem>>
      %40 = tpu.memref_slice %arg16[%c1_i32_23] : memref<8x!tpu.dma_semaphore, #tpu.memory_space<semaphore_mem>> -> memref<1x!tpu.dma_semaphore, #tpu.memory_space<semaphore_mem>>
      %41 = tpu.memref_squeeze %40 : memref<1x!tpu.dma_semaphore, #tpu.memory_space<semaphore_mem>> -> memref<!tpu.dma_semaphore, #tpu.memory_space<semaphore_mem>>
      tpu.enqueue_dma source(%38 : memref<1x128xf32, #tpu.memory_space<any>>) target(%39 : memref<1x128xf32, #tpu.memory_space<vmem>>) target_semaphore(%41 : memref<!tpu.dma_semaphore, #tpu.memory_space<semaphore_mem>>)
      %c2 = arith.constant 2 : index
      %42 = memref.load %arg1[%c2] : memref<8xi32, #tpu.memory_space<smem>>
      %c2_i32 = arith.constant 2 : i32
      %c0_i32_27 = arith.constant 0 : i32
      %43 = tpu.memref_slice %arg2[%42, %c0_i32_27] : memref<300x128xf32, #tpu.memory_space<any>> -> memref<1x128xf32, #tpu.memory_space<any>>
      %c2_i32_28 = arith.constant 2 : i32
      %c0_i32_29 = arith.constant 0 : i32
      %44 = tpu.memref_slice %arg12[%c2_i32_28, %c0_i32_29] : memref<8x128xf32, #tpu.memory_space<vmem>> -> memref<1x128xf32, #tpu.memory_space<vmem>>
      %45 = tpu.memref_slice %arg16[%c2_i32] : memref<8x!tpu.dma_semaphore, #tpu.memory_space<semaphore_mem>> -> memref<1x!tpu.dma_semaphore, #tpu.memory_space<semaphore_mem>>
      %46 = tpu.memref_squeeze %45 : memref<1x!tpu.dma_semaphore, #tpu.memory_space<semaphore_mem>> -> memref<!tpu.dma_semaphore, #tpu.memory_space<semaphore_mem>>
      tpu.enqueue_dma source(%43 : memref<1x128xf32, #tpu.memory_space<any>>) target(%44 : memref<1x128xf32, #tpu.memory_space<vmem>>) target_semaphore(%46 : memref<!tpu.dma_semaphore, #tpu.memory_space<semaphore_mem>>)
      %c3 = arith.constant 3 : index
      %47 = memref.load %arg1[%c3] : memref<8xi32, #tpu.memory_space<smem>>
      %c3_i32 = arith.constant 3 : i32
      %c0_i32_30 = arith.constant 0 : i32
      %48 = tpu.memref_slice %arg2[%47, %c0_i32_30] : memref<300x128xf32, #tpu.memory_space<any>> -> memref<1x128xf32, #tpu.memory_space<any>>
      %c3_i32_31 = arith.constant 3 : i32
      %c0_i32_32 = arith.constant 0 : i32
      %49 = tpu.memref_slice %arg12[%c3_i32_31, %c0_i32_32] : memref<8x128xf32, #tpu.memory_space<vmem>> -> memref<1x128xf32, #tpu.memory_space<vmem>>
      %50 = tpu.memref_slice %arg16[%c3_i32] : memref<8x!tpu.dma_semaphore, #tpu.memory_space<semaphore_mem>> -> memref<1x!tpu.dma_semaphore, #tpu.memory_space<semaphore_mem>>
      %51 = tpu.memref_squeeze %50 : memref<1x!tpu.dma_semaphore, #tpu.memory_space<semaphore_mem>> -> memref<!tpu.dma_semaphore, #tpu.memory_space<semaphore_mem>>
      tpu.enqueue_dma source(%48 : memref<1x128xf32, #tpu.memory_space<any>>) target(%49 : memref<1x128xf32, #tpu.memory_space<vmem>>) target_semaphore(%51 : memref<!tpu.dma_semaphore, #tpu.memory_space<semaphore_mem>>)
      %c4 = arith.constant 4 : index
      %52 = memref.load %arg1[%c4] : memref<8xi32, #tpu.memory_space<smem>>
      %c4_i32 = arith.constant 4 : i32
      %c0_i32_33 = arith.constant 0 : i32
      %53 = tpu.memref_slice %arg2[%52, %c0_i32_33] : memref<300x128xf32, #tpu.memory_space<any>> -> memref<1x128xf32, #tpu.memory_space<any>>
      %c4_i32_34 = arith.constant 4 : i32
      %c0_i32_35 = arith.constant 0 : i32
      %54 = tpu.memref_slice %arg12[%c4_i32_34, %c0_i32_35] : memref<8x128xf32, #tpu.memory_space<vmem>> -> memref<1x128xf32, #tpu.memory_space<vmem>>
      %55 = tpu.memref_slice %arg16[%c4_i32] : memref<8x!tpu.dma_semaphore, #tpu.memory_space<semaphore_mem>> -> memref<1x!tpu.dma_semaphore, #tpu.memory_space<semaphore_mem>>
      %56 = tpu.memref_squeeze %55 : memref<1x!tpu.dma_semaphore, #tpu.memory_space<semaphore_mem>> -> memref<!tpu.dma_semaphore, #tpu.memory_space<semaphore_mem>>
      tpu.enqueue_dma source(%53 : memref<1x128xf32, #tpu.memory_space<any>>) target(%54 : memref<1x128xf32, #tpu.memory_space<vmem>>) target_semaphore(%56 : memref<!tpu.dma_semaphore, #tpu.memory_space<semaphore_mem>>)
      %c5 = arith.constant 5 : index
      %57 = memref.load %arg1[%c5] : memref<8xi32, #tpu.memory_space<smem>>
      %c5_i32 = arith.constant 5 : i32
      %c0_i32_36 = arith.constant 0 : i32
      %58 = tpu.memref_slice %arg2[%57, %c0_i32_36] : memref<300x128xf32, #tpu.memory_space<any>> -> memref<1x128xf32, #tpu.memory_space<any>>
      %c5_i32_37 = arith.constant 5 : i32
      %c0_i32_38 = arith.constant 0 : i32
      %59 = tpu.memref_slice %arg12[%c5_i32_37, %c0_i32_38] : memref<8x128xf32, #tpu.memory_space<vmem>> -> memref<1x128xf32, #tpu.memory_space<vmem>>
      %60 = tpu.memref_slice %arg16[%c5_i32] : memref<8x!tpu.dma_semaphore, #tpu.memory_space<semaphore_mem>> -> memref<1x!tpu.dma_semaphore, #tpu.memory_space<semaphore_mem>>
      %61 = tpu.memref_squeeze %60 : memref<1x!tpu.dma_semaphore, #tpu.memory_space<semaphore_mem>> -> memref<!tpu.dma_semaphore, #tpu.memory_space<semaphore_mem>>
      tpu.enqueue_dma source(%58 : memref<1x128xf32, #tpu.memory_space<any>>) target(%59 : memref<1x128xf32, #tpu.memory_space<vmem>>) target_semaphore(%61 : memref<!tpu.dma_semaphore, #tpu.memory_space<semaphore_mem>>)
      %c6 = arith.constant 6 : index
      %62 = memref.load %arg1[%c6] : memref<8xi32, #tpu.memory_space<smem>>
      %c6_i32 = arith.constant 6 : i32
      %c0_i32_39 = arith.constant 0 : i32
      %63 = tpu.memref_slice %arg2[%62, %c0_i32_39] : memref<300x128xf32, #tpu.memory_space<any>> -> memref<1x128xf32, #tpu.memory_space<any>>
      %c6_i32_40 = arith.constant 6 : i32
      %c0_i32_41 = arith.constant 0 : i32
      %64 = tpu.memref_slice %arg12[%c6_i32_40, %c0_i32_41] : memref<8x128xf32, #tpu.memory_space<vmem>> -> memref<1x128xf32, #tpu.memory_space<vmem>>
      %65 = tpu.memref_slice %arg16[%c6_i32] : memref<8x!tpu.dma_semaphore, #tpu.memory_space<semaphore_mem>> -> memref<1x!tpu.dma_semaphore, #tpu.memory_space<semaphore_mem>>
      %66 = tpu.memref_squeeze %65 : memref<1x!tpu.dma_semaphore, #tpu.memory_space<semaphore_mem>> -> memref<!tpu.dma_semaphore, #tpu.memory_space<semaphore_mem>>
      tpu.enqueue_dma source(%63 : memref<1x128xf32, #tpu.memory_space<any>>) target(%64 : memref<1x128xf32, #tpu.memory_space<vmem>>) target_semaphore(%66 : memref<!tpu.dma_semaphore, #tpu.memory_space<semaphore_mem>>)
      %c7 = arith.constant 7 : index
      %67 = memref.load %arg1[%c7] : memref<8xi32, #tpu.memory_space<smem>>
      %c7_i32 = arith.constant 7 : i32
      %c0_i32_42 = arith.constant 0 : i32
      %68 = tpu.memref_slice %arg2[%67, %c0_i32_42] : memref<300x128xf32, #tpu.memory_space<any>> -> memref<1x128xf32, #tpu.memory_space<any>>
      %c7_i32_43 = arith.constant 7 : i32
      %c0_i32_44 = arith.constant 0 : i32
      %69 = tpu.memref_slice %arg12[%c7_i32_43, %c0_i32_44] : memref<8x128xf32, #tpu.memory_space<vmem>> -> memref<1x128xf32, #tpu.memory_space<vmem>>
      %70 = tpu.memref_slice %arg16[%c7_i32] : memref<8x!tpu.dma_semaphore, #tpu.memory_space<semaphore_mem>> -> memref<1x!tpu.dma_semaphore, #tpu.memory_space<semaphore_mem>>
      %71 = tpu.memref_squeeze %70 : memref<1x!tpu.dma_semaphore, #tpu.memory_space<semaphore_mem>> -> memref<!tpu.dma_semaphore, #tpu.memory_space<semaphore_mem>>
      tpu.enqueue_dma source(%68 : memref<1x128xf32, #tpu.memory_space<any>>) target(%69 : memref<1x128xf32, #tpu.memory_space<vmem>>) target_semaphore(%71 : memref<!tpu.dma_semaphore, #tpu.memory_space<semaphore_mem>>)
      %c0_i32_45 = arith.constant 0 : i32
      %c0_i32_46 = arith.constant 0 : i32
      %72 = tpu.memref_slice %arg2[%32, %c0_i32_46] : memref<300x128xf32, #tpu.memory_space<any>> -> memref<1x128xf32, #tpu.memory_space<any>>
      %c0_i32_47 = arith.constant 0 : i32
      %c0_i32_48 = arith.constant 0 : i32
      %73 = tpu.memref_slice %arg12[%c0_i32_47, %c0_i32_48] : memref<8x128xf32, #tpu.memory_space<vmem>> -> memref<1x128xf32, #tpu.memory_space<vmem>>
      %74 = tpu.memref_slice %arg16[%c0_i32_45] : memref<8x!tpu.dma_semaphore, #tpu.memory_space<semaphore_mem>> -> memref<1x!tpu.dma_semaphore, #tpu.memory_space<semaphore_mem>>
      %75 = tpu.memref_squeeze %74 : memref<1x!tpu.dma_semaphore, #tpu.memory_space<semaphore_mem>> -> memref<!tpu.dma_semaphore, #tpu.memory_space<semaphore_mem>>
      tpu.wait_dma2 semaphore(%75 : memref<!tpu.dma_semaphore, #tpu.memory_space<semaphore_mem>>) src(%72 : memref<1x128xf32, #tpu.memory_space<any>>) dst(%73 : memref<1x128xf32, #tpu.memory_space<vmem>>)
      %c1_i32_49 = arith.constant 1 : i32
      %c0_i32_50 = arith.constant 0 : i32
      %76 = tpu.memref_slice %arg2[%37, %c0_i32_50] : memref<300x128xf32, #tpu.memory_space<any>> -> memref<1x128xf32, #tpu.memory_space<any>>
      %c1_i32_51 = arith.constant 1 : i32
      %c0_i32_52 = arith.constant 0 : i32
      %77 = tpu.memref_slice %arg12[%c1_i32_51, %c0_i32_52] : memref<8x128xf32, #tpu.memory_space<vmem>> -> memref<1x128xf32, #tpu.memory_space<vmem>>
      %78 = tpu.memref_slice %arg16[%c1_i32_49] : memref<8x!tpu.dma_semaphore, #tpu.memory_space<semaphore_mem>> -> memref<1x!tpu.dma_semaphore, #tpu.memory_space<semaphore_mem>>
      %79 = tpu.memref_squeeze %78 : memref<1x!tpu.dma_semaphore, #tpu.memory_space<semaphore_mem>> -> memref<!tpu.dma_semaphore, #tpu.memory_space<semaphore_mem>>
      tpu.wait_dma2 semaphore(%79 : memref<!tpu.dma_semaphore, #tpu.memory_space<semaphore_mem>>) src(%76 : memref<1x128xf32, #tpu.memory_space<any>>) dst(%77 : memref<1x128xf32, #tpu.memory_space<vmem>>)
      %c2_i32_53 = arith.constant 2 : i32
      %c0_i32_54 = arith.constant 0 : i32
      %80 = tpu.memref_slice %arg2[%42, %c0_i32_54] : memref<300x128xf32, #tpu.memory_space<any>> -> memref<1x128xf32, #tpu.memory_space<any>>
      %c2_i32_55 = arith.constant 2 : i32
      %c0_i32_56 = arith.constant 0 : i32
      %81 = tpu.memref_slice %arg12[%c2_i32_55, %c0_i32_56] : memref<8x128xf32, #tpu.memory_space<vmem>> -> memref<1x128xf32, #tpu.memory_space<vmem>>
      %82 = tpu.memref_slice %arg16[%c2_i32_53] : memref<8x!tpu.dma_semaphore, #tpu.memory_space<semaphore_mem>> -> memref<1x!tpu.dma_semaphore, #tpu.memory_space<semaphore_mem>>
      %83 = tpu.memref_squeeze %82 : memref<1x!tpu.dma_semaphore, #tpu.memory_space<semaphore_mem>> -> memref<!tpu.dma_semaphore, #tpu.memory_space<semaphore_mem>>
      tpu.wait_dma2 semaphore(%83 : memref<!tpu.dma_semaphore, #tpu.memory_space<semaphore_mem>>) src(%80 : memref<1x128xf32, #tpu.memory_space<any>>) dst(%81 : memref<1x128xf32, #tpu.memory_space<vmem>>)
      %c3_i32_57 = arith.constant 3 : i32
      %c0_i32_58 = arith.constant 0 : i32
      %84 = tpu.memref_slice %arg2[%47, %c0_i32_58] : memref<300x128xf32, #tpu.memory_space<any>> -> memref<1x128xf32, #tpu.memory_space<any>>
      %c3_i32_59 = arith.constant 3 : i32
      %c0_i32_60 = arith.constant 0 : i32
      %85 = tpu.memref_slice %arg12[%c3_i32_59, %c0_i32_60] : memref<8x128xf32, #tpu.memory_space<vmem>> -> memref<1x128xf32, #tpu.memory_space<vmem>>
      %86 = tpu.memref_slice %arg16[%c3_i32_57] : memref<8x!tpu.dma_semaphore, #tpu.memory_space<semaphore_mem>> -> memref<1x!tpu.dma_semaphore, #tpu.memory_space<semaphore_mem>>
      %87 = tpu.memref_squeeze %86 : memref<1x!tpu.dma_semaphore, #tpu.memory_space<semaphore_mem>> -> memref<!tpu.dma_semaphore, #tpu.memory_space<semaphore_mem>>
      tpu.wait_dma2 semaphore(%87 : memref<!tpu.dma_semaphore, #tpu.memory_space<semaphore_mem>>) src(%84 : memref<1x128xf32, #tpu.memory_space<any>>) dst(%85 : memref<1x128xf32, #tpu.memory_space<vmem>>)
      %c4_i32_61 = arith.constant 4 : i32
      %c0_i32_62 = arith.constant 0 : i32
      %88 = tpu.memref_slice %arg2[%52, %c0_i32_62] : memref<300x128xf32, #tpu.memory_space<any>> -> memref<1x128xf32, #tpu.memory_space<any>>
      %c4_i32_63 = arith.constant 4 : i32
      %c0_i32_64 = arith.constant 0 : i32
      %89 = tpu.memref_slice %arg12[%c4_i32_63, %c0_i32_64] : memref<8x128xf32, #tpu.memory_space<vmem>> -> memref<1x128xf32, #tpu.memory_space<vmem>>
      %90 = tpu.memref_slice %arg16[%c4_i32_61] : memref<8x!tpu.dma_semaphore, #tpu.memory_space<semaphore_mem>> -> memref<1x!tpu.dma_semaphore, #tpu.memory_space<semaphore_mem>>
      %91 = tpu.memref_squeeze %90 : memref<1x!tpu.dma_semaphore, #tpu.memory_space<semaphore_mem>> -> memref<!tpu.dma_semaphore, #tpu.memory_space<semaphore_mem>>
      tpu.wait_dma2 semaphore(%91 : memref<!tpu.dma_semaphore, #tpu.memory_space<semaphore_mem>>) src(%88 : memref<1x128xf32, #tpu.memory_space<any>>) dst(%89 : memref<1x128xf32, #tpu.memory_space<vmem>>)
      %c5_i32_65 = arith.constant 5 : i32
      %c0_i32_66 = arith.constant 0 : i32
      %92 = tpu.memref_slice %arg2[%57, %c0_i32_66] : memref<300x128xf32, #tpu.memory_space<any>> -> memref<1x128xf32, #tpu.memory_space<any>>
      %c5_i32_67 = arith.constant 5 : i32
      %c0_i32_68 = arith.constant 0 : i32
      %93 = tpu.memref_slice %arg12[%c5_i32_67, %c0_i32_68] : memref<8x128xf32, #tpu.memory_space<vmem>> -> memref<1x128xf32, #tpu.memory_space<vmem>>
      %94 = tpu.memref_slice %arg16[%c5_i32_65] : memref<8x!tpu.dma_semaphore, #tpu.memory_space<semaphore_mem>> -> memref<1x!tpu.dma_semaphore, #tpu.memory_space<semaphore_mem>>
      %95 = tpu.memref_squeeze %94 : memref<1x!tpu.dma_semaphore, #tpu.memory_space<semaphore_mem>> -> memref<!tpu.dma_semaphore, #tpu.memory_space<semaphore_mem>>
      tpu.wait_dma2 semaphore(%95 : memref<!tpu.dma_semaphore, #tpu.memory_space<semaphore_mem>>) src(%92 : memref<1x128xf32, #tpu.memory_space<any>>) dst(%93 : memref<1x128xf32, #tpu.memory_space<vmem>>)
      %c6_i32_69 = arith.constant 6 : i32
      %c0_i32_70 = arith.constant 0 : i32
      %96 = tpu.memref_slice %arg2[%62, %c0_i32_70] : memref<300x128xf32, #tpu.memory_space<any>> -> memref<1x128xf32, #tpu.memory_space<any>>
      %c6_i32_71 = arith.constant 6 : i32
      %c0_i32_72 = arith.constant 0 : i32
      %97 = tpu.memref_slice %arg12[%c6_i32_71, %c0_i32_72] : memref<8x128xf32, #tpu.memory_space<vmem>> -> memref<1x128xf32, #tpu.memory_space<vmem>>
      %98 = tpu.memref_slice %arg16[%c6_i32_69] : memref<8x!tpu.dma_semaphore, #tpu.memory_space<semaphore_mem>> -> memref<1x!tpu.dma_semaphore, #tpu.memory_space<semaphore_mem>>
      %99 = tpu.memref_squeeze %98 : memref<1x!tpu.dma_semaphore, #tpu.memory_space<semaphore_mem>> -> memref<!tpu.dma_semaphore, #tpu.memory_space<semaphore_mem>>
      tpu.wait_dma2 semaphore(%99 : memref<!tpu.dma_semaphore, #tpu.memory_space<semaphore_mem>>) src(%96 : memref<1x128xf32, #tpu.memory_space<any>>) dst(%97 : memref<1x128xf32, #tpu.memory_space<vmem>>)
      %c7_i32_73 = arith.constant 7 : i32
      %c0_i32_74 = arith.constant 0 : i32
      %100 = tpu.memref_slice %arg2[%67, %c0_i32_74] : memref<300x128xf32, #tpu.memory_space<any>> -> memref<1x128xf32, #tpu.memory_space<any>>
      %c7_i32_75 = arith.constant 7 : i32
      %c0_i32_76 = arith.constant 0 : i32
      %101 = tpu.memref_slice %arg12[%c7_i32_75, %c0_i32_76] : memref<8x128xf32, #tpu.memory_space<vmem>> -> memref<1x128xf32, #tpu.memory_space<vmem>>
      %102 = tpu.memref_slice %arg16[%c7_i32_73] : memref<8x!tpu.dma_semaphore, #tpu.memory_space<semaphore_mem>> -> memref<1x!tpu.dma_semaphore, #tpu.memory_space<semaphore_mem>>
      %103 = tpu.memref_squeeze %102 : memref<1x!tpu.dma_semaphore, #tpu.memory_space<semaphore_mem>> -> memref<!tpu.dma_semaphore, #tpu.memory_space<semaphore_mem>>
      tpu.wait_dma2 semaphore(%103 : memref<!tpu.dma_semaphore, #tpu.memory_space<semaphore_mem>>) src(%100 : memref<1x128xf32, #tpu.memory_space<any>>) dst(%101 : memref<1x128xf32, #tpu.memory_space<vmem>>)
      %c0_77 = arith.constant 0 : index
      %c0_78 = arith.constant 0 : index
      %104 = vector.load %arg12[%c0_77, %c0_78] : memref<8x128xf32, #tpu.memory_space<vmem>>, vector<8x128xf32>
      %cst_79 = arith.constant 0.000000e+00 : f32
      %105 = vector.broadcast %cst_79 : f32 to vector<8x128xf32>
      %106 = arith.maximumf %104, %105 : vector<8x128xf32>
      %c0_80 = arith.constant 0 : index
      %c0_81 = arith.constant 0 : index
      %107 = vector.load %arg3[%c0_80, %c0_81] : memref<8x128xf32, #tpu.memory_space<vmem>>, vector<8x128xf32>
      %108 = tpu.concatenate %106, %107 in 1 : vector<8x128xf32>, vector<8x128xf32> -> vector<8x256xf32>
      %109 = arith.truncf %108 : vector<8x256xf32> to vector<8x256xbf16>
      %c0_82 = arith.constant 0 : index
      %c0_83 = arith.constant 0 : index
      %110 = vector.load %arg5[%c0_82, %c0_83] : memref<256x512xbf16, #tpu.memory_space<vmem>>, vector<256x512xbf16>
      %cst_84 = arith.constant dense<0.000000e+00> : vector<8x512xf32>
      %111 = tpu.matmul %109, %110, %cst_84 {dimension_numbers = #tpu.dot_dimension_numbers<[1], [0], [0], [1], [0, 0, 1, 1], [], []>} : vector<8x256xbf16>, vector<256x512xbf16>, vector<8x512xf32> -> vector<8x512xf32>
      %c0_85 = arith.constant 0 : index
      %c0_86 = arith.constant 0 : index
      %112 = vector.load %arg6[%c0_85, %c0_86] : memref<1x512xf32, #tpu.memory_space<vmem>>, vector<1x512xf32>
      %113 = vector.broadcast %112 : vector<1x512xf32> to vector<8x512xf32>
      %114 = arith.addf %111, %113 : vector<8x512xf32>
      %115 = vector.extract_strided_slice %114 {offsets = [0, 0], sizes = [8, 128], strides = [1, 1]} : vector<8x512xf32> to vector<8x128xf32>
      %116 = arith.negf %115 : vector<8x128xf32>
      %117 = math.exp %116 : vector<8x128xf32>
      %cst_87 = arith.constant 1.000000e+00 : f32
      %118 = vector.broadcast %cst_87 : f32 to vector<8x128xf32>
      %119 = arith.addf %118, %117 : vector<8x128xf32>
      %120 = arith.divf %118, %119 : vector<8x128xf32>
      %121 = vector.extract_strided_slice %114 {offsets = [0, 128], sizes = [8, 128], strides = [1, 1]} : vector<8x512xf32> to vector<8x128xf32>
      %122 = arith.negf %121 : vector<8x128xf32>
      %123 = math.exp %122 : vector<8x128xf32>
      %cst_88 = arith.constant 1.000000e+00 : f32
      %124 = vector.broadcast %cst_88 : f32 to vector<8x128xf32>
      %125 = arith.addf %124, %123 : vector<8x128xf32>
      %126 = arith.divf %124, %125 : vector<8x128xf32>
      %127 = vector.extract_strided_slice %114 {offsets = [0, 256], sizes = [8, 128], strides = [1, 1]} : vector<8x512xf32> to vector<8x128xf32>
      %128 = math.tanh %127 : vector<8x128xf32>
      %129 = vector.extract_strided_slice %114 {offsets = [0, 384], sizes = [8, 128], strides = [1, 1]} : vector<8x512xf32> to vector<8x128xf32>
      %130 = arith.negf %129 : vector<8x128xf32>
      %131 = math.exp %130 : vector<8x128xf32>
      %cst_89 = arith.constant 1.000000e+00 : f32
      %132 = vector.broadcast %cst_89 : f32 to vector<8x128xf32>
      %133 = arith.addf %132, %131 : vector<8x128xf32>
      %134 = arith.divf %132, %133 : vector<8x128xf32>
      %c0_90 = arith.constant 0 : index
      %c0_91 = arith.constant 0 : index
      %135 = vector.load %arg4[%c0_90, %c0_91] : memref<8x128xf32, #tpu.memory_space<vmem>>, vector<8x128xf32>
      %136 = arith.mulf %126, %135 : vector<8x128xf32>
      %137 = arith.mulf %120, %128 : vector<8x128xf32>
      %138 = arith.addf %136, %137 : vector<8x128xf32>
      %139 = math.tanh %138 : vector<8x128xf32>
      %140 = arith.mulf %134, %139 : vector<8x128xf32>
      %c0_92 = arith.constant 0 : index
      %c0_93 = arith.constant 0 : index
      %141 = vector.load %arg10[%c0_92, %c0_93] : memref<8x128xf32, #tpu.memory_space<vmem>>, vector<8x128xf32>
      tpu.vector_store %arg10[%c0_92, %c0_93], %140 {strides = array<i32>} : memref<8x128xf32, #tpu.memory_space<vmem>>, vector<8x128xf32>,
      %c0_94 = arith.constant 0 : index
      %c0_95 = arith.constant 0 : index
      %142 = vector.load %arg11[%c0_94, %c0_95] : memref<8x128xf32, #tpu.memory_space<vmem>>, vector<8x128xf32>
      tpu.vector_store %arg11[%c0_94, %c0_95], %138 {strides = array<i32>} : memref<8x128xf32, #tpu.memory_space<vmem>>, vector<8x128xf32>,
      %143 = arith.truncf %140 : vector<8x128xf32> to vector<8x128xbf16>
      %c0_96 = arith.constant 0 : index
      %c0_97 = arith.constant 0 : index
      %144 = vector.load %arg13[%c0_96, %c0_97] : memref<8x128xbf16, #tpu.memory_space<vmem>>, vector<8x128xbf16>
      tpu.vector_store %arg13[%c0_96, %c0_97], %143 {strides = array<i32>} : memref<8x128xbf16, #tpu.memory_space<vmem>>, vector<8x128xbf16>,
      %cst_98 = arith.constant 0xFF800000 : f32
      %145 = vector.broadcast %cst_98 : f32 to vector<8x1xf32>
      %c0_99 = arith.constant 0 : index
      %c0_100 = arith.constant 0 : index
      %146 = vector.load %arg14[%c0_99, %c0_100] : memref<8x1xf32, #tpu.memory_space<vmem>>, vector<8x1xf32>
      tpu.vector_store %arg14[%c0_99, %c0_100], %145 {strides = array<i32>} : memref<8x1xf32, #tpu.memory_space<vmem>>, vector<8x1xf32>,
      %cst_101 = arith.constant 0.000000e+00 : f32
      %147 = vector.broadcast %cst_101 : f32 to vector<8x1xf32>
      %c0_102 = arith.constant 0 : index
      %c0_103 = arith.constant 0 : index
      %148 = vector.load %arg15[%c0_102, %c0_103] : memref<8x1xf32, #tpu.memory_space<vmem>>, vector<8x1xf32>
      tpu.vector_store %arg15[%c0_102, %c0_103], %147 {strides = array<i32>} : memref<8x1xf32, #tpu.memory_space<vmem>>, vector<8x1xf32>,
    } else {
    }
    %c0 = arith.constant 0 : index
    %c0_1 = arith.constant 0 : index
    %3 = vector.load %arg13[%c0, %c0_1] : memref<8x128xbf16, #tpu.memory_space<vmem>>, vector<8x128xbf16>
    %c0_2 = arith.constant 0 : index
    %c0_3 = arith.constant 0 : index
    %4 = vector.load %arg7[%c0_2, %c0_3] : memref<128x256xbf16, #tpu.memory_space<vmem>>, vector<128x256xbf16>
    %cst = arith.constant dense<0.000000e+00> : vector<8x256xf32>
    %5 = tpu.matmul %3, %4, %cst {dimension_numbers = #tpu.dot_dimension_numbers<[1], [0], [0], [1], [0, 0, 1, 1], [], []>} : vector<8x128xbf16>, vector<128x256xbf16>, vector<8x256xf32> -> vector<8x256xf32>
    %c0_4 = arith.constant 0 : index
    %c0_5 = arith.constant 0 : index
    %6 = vector.load %arg8[%c0_4, %c0_5] : memref<1x256xf32, #tpu.memory_space<vmem>>, vector<1x256xf32>
    %7 = vector.broadcast %6 : vector<1x256xf32> to vector<8x256xf32>
    %8 = arith.addf %5, %7 : vector<8x256xf32>
    %c256_i32 = arith.constant 256 : i32
    %9 = arith.muli %arg0, %c256_i32 : i32
    %10 = tpu.assume_multiple %9, 256 : i32
    %c0_6 = arith.constant 0 : index
    %11 = arith.index_cast %10 : i32 to index
    %12 = vector.load %arg9[%c0_6, %11] : memref<8x512xf32, #tpu.memory_space<vmem>>, vector<8x256xf32>
    tpu.vector_store %arg9[%c0_6, %11], %8 {strides = array<i32>} : memref<8x512xf32, #tpu.memory_space<vmem>>, vector<8x256xf32>,
    %c0_7 = arith.constant 0 : index
    %c0_8 = arith.constant 0 : index
    %13 = vector.load %arg14[%c0_7, %c0_8] : memref<8x1xf32, #tpu.memory_space<vmem>>, vector<8x1xf32>
    %cst_9 = arith.constant dense<0xFF800000> : vector<8xf32>
    %14 = vector.multi_reduction <maximumf>, %8, %cst_9 [1] : vector<8x256xf32> to vector<8xf32>
    %15 = vector.shape_cast %14 : vector<8xf32> to vector<8x1xf32>
    %16 = arith.maximumf %13, %15 : vector<8x1xf32>
    %c0_10 = arith.constant 0 : index
    %c0_11 = arith.constant 0 : index
    %17 = vector.load %arg15[%c0_10, %c0_11] : memref<8x1xf32, #tpu.memory_space<vmem>>, vector<8x1xf32>
    %18 = arith.subf %13, %16 : vector<8x1xf32>
    %19 = math.exp %18 : vector<8x1xf32>
    %20 = arith.mulf %17, %19 : vector<8x1xf32>
    %21 = vector.broadcast %16 : vector<8x1xf32> to vector<8x256xf32>
    %22 = arith.subf %8, %21 : vector<8x256xf32>
    %23 = math.exp %22 : vector<8x256xf32>
    %cst_12 = arith.constant dense<0.000000e+00> : vector<8xf32>
    %24 = vector.multi_reduction <add>, %23, %cst_12 [1] : vector<8x256xf32> to vector<8xf32>
    %25 = vector.shape_cast %24 : vector<8xf32> to vector<8x1xf32>
    %26 = arith.addf %20, %25 : vector<8x1xf32>
    %c0_13 = arith.constant 0 : index
    %c0_14 = arith.constant 0 : index
    %27 = vector.load %arg15[%c0_13, %c0_14] : memref<8x1xf32, #tpu.memory_space<vmem>>, vector<8x1xf32>
    tpu.vector_store %arg15[%c0_13, %c0_14], %26 {strides = array<i32>} : memref<8x1xf32, #tpu.memory_space<vmem>>, vector<8x1xf32>,
    %c0_15 = arith.constant 0 : index
    %c0_16 = arith.constant 0 : index
    %28 = vector.load %arg14[%c0_15, %c0_16] : memref<8x1xf32, #tpu.memory_space<vmem>>, vector<8x1xf32>
    tpu.vector_store %arg14[%c0_15, %c0_16], %16 {strides = array<i32>} : memref<8x1xf32, #tpu.memory_space<vmem>>, vector<8x1xf32>,
    %c1_i32 = arith.constant 1 : i32
    %29 = arith.cmpi eq, %arg0, %c1_i32 : i32
    %30 = arith.extui %29 : i1 to i32
    %c0_i32_17 = arith.constant 0 : i32
    %31 = arith.cmpi ne, %30, %c0_i32_17 : i32
    scf.if %31 {
      %c0_18 = arith.constant 0 : index
      %c0_19 = arith.constant 0 : index
      %32 = vector.load %arg14[%c0_18, %c0_19] : memref<8x1xf32, #tpu.memory_space<vmem>>, vector<8x1xf32>
      %c0_20 = arith.constant 0 : index
      %c0_21 = arith.constant 0 : index
      %33 = vector.load %arg15[%c0_20, %c0_21] : memref<8x1xf32, #tpu.memory_space<vmem>>, vector<8x1xf32>
      %34 = math.log %33 : vector<8x1xf32>
      %35 = arith.addf %32, %34 : vector<8x1xf32>
      %c0_22 = arith.constant 0 : index
      %c0_23 = arith.constant 0 : index
      %36 = vector.load %arg9[%c0_22, %c0_23] : memref<8x512xf32, #tpu.memory_space<vmem>>, vector<8x512xf32>
      %37 = vector.broadcast %35 : vector<8x1xf32> to vector<8x512xf32>
      %38 = arith.subf %36, %37 : vector<8x512xf32>
      %c0_24 = arith.constant 0 : index
      %c0_25 = arith.constant 0 : index
      %39 = vector.load %arg9[%c0_24, %c0_25] : memref<8x512xf32, #tpu.memory_space<vmem>>, vector<8x512xf32>
      tpu.vector_store %arg9[%c0_24, %c0_25], %38 {strides = array<i32>} : memref<8x512xf32, #tpu.memory_space<vmem>>, vector<8x512xf32>,
    } else {
    }
    return
  }
  func.func @transform_1(%arg0: i32, %arg1: memref<8xi32, #tpu.memory_space<smem>>) -> (i32, i32) {
    %c0_i32 = arith.constant 0 : i32
    %c0_i32_0 = arith.constant 0 : i32
    %c0_i32_1 = arith.constant 0 : i32
    return %c0_i32, %c0_i32_0 : i32, i32
  }
  func.func @transform_2(%arg0: i32, %arg1: memref<8xi32, #tpu.memory_space<smem>>) -> (i32, i32) {
    %c0_i32 = arith.constant 0 : i32
    %c0_i32_0 = arith.constant 0 : i32
    %c0_i32_1 = arith.constant 0 : i32
    return %c0_i32, %c0_i32_0 : i32, i32
  }
  func.func @transform_3(%arg0: i32, %arg1: memref<8xi32, #tpu.memory_space<smem>>) -> (i32, i32) {
    %c0_i32 = arith.constant 0 : i32
    %c0_i32_0 = arith.constant 0 : i32
    %c0_i32_1 = arith.constant 0 : i32
    return %c0_i32, %c0_i32_0 : i32, i32
  }
  func.func @transform_4(%arg0: i32, %arg1: memref<8xi32, #tpu.memory_space<smem>>) -> (i32, i32) {
    %c0_i32 = arith.constant 0 : i32
    %c0_i32_0 = arith.constant 0 : i32
    %c0_i32_1 = arith.constant 0 : i32
    return %c0_i32, %c0_i32_0 : i32, i32
  }
  func.func @transform_5(%arg0: i32, %arg1: memref<8xi32, #tpu.memory_space<smem>>) -> (i32, i32) {
    %c0_i32 = arith.constant 0 : i32
    %c0_i32_0 = arith.constant 0 : i32
    return %c0_i32, %arg0 : i32, i32
  }
  func.func @transform_6(%arg0: i32, %arg1: memref<8xi32, #tpu.memory_space<smem>>) -> (i32, i32) {
    %c0_i32 = arith.constant 0 : i32
    %c0_i32_0 = arith.constant 0 : i32
    return %c0_i32, %arg0 : i32, i32
  }
  func.func @transform_7(%arg0: i32, %arg1: memref<8xi32, #tpu.memory_space<smem>>) -> (i32, i32) {
    %c0_i32 = arith.constant 0 : i32
    %c0_i32_0 = arith.constant 0 : i32
    %c0_i32_1 = arith.constant 0 : i32
    return %c0_i32, %c0_i32_0 : i32, i32
  }
  func.func @transform_8(%arg0: i32, %arg1: memref<8xi32, #tpu.memory_space<smem>>) -> (i32, i32) {
    %c0_i32 = arith.constant 0 : i32
    %c0_i32_0 = arith.constant 0 : i32
    %c0_i32_1 = arith.constant 0 : i32
    return %c0_i32, %c0_i32_0 : i32, i32
  }
  func.func @transform_9(%arg0: i32, %arg1: memref<8xi32, #tpu.memory_space<smem>>) -> (i32, i32) {
    %c0_i32 = arith.constant 0 : i32
    %c0_i32_0 = arith.constant 0 : i32
    %c0_i32_1 = arith.constant 0 : i32
    return %c0_i32, %c0_i32_0 : i32, i32
  }
}

</mosaic_0001>

<bundles_post_ra>
// kernel: tpu_custom_call.1
= control target key start
LH: loop header
LB: loop body
LE: loop exit
PB: predicated region body
PF: predicated region fallthrough
CT: control target
= control target key end

     0   :  { %s2765_s0 = inlined_call_operand.hbm [shape: s32[8], index: 0, kind: input, shape index: {}]   ;;  %s2766_s1 = inlined_call_operand.hbm [shape: f32[300,128], index: 1, kind: input, shape index: {}]   ;;  %s2767_s2 = inlined_call_operand.hbm [shape: f32[8,128], index: 2, kind: input, shape index: {}]   ;;  %s2768_s3 = inlined_call_operand.vmem [shape: f32[8,128], index: 3, kind: input, shape index: {}]   ;;  %s2769_s4 = inlined_call_operand.hbm [shape: bf16[256,512], index: 4, kind: input, shape index: {}]   ;;  %s2770_s5 = inlined_call_operand.vmem [shape: f32[1,512], index: 5, kind: input, shape index: {}]   ;;  %s2771_s6 = inlined_call_operand.hbm [shape: bf16[128,512], index: 6, kind: input, shape index: {}]   ;;  %s2772_s7 = inlined_call_operand.vmem [shape: f32[1,512], index: 7, kind: input, shape index: {}]   ;;  %s2773_s8 = inlined_call_operand.hbm [shape: f32[8,512], index: 8, kind: output, shape index: {0}]   ;;  %s2774_s9 = inlined_call_operand.hbm [shape: f32[8,128], index: 9, kind: output, shape index: {1}]   ;;  %s2775_s10 = inlined_call_operand.hbm [shape: f32[8,128], index: 10, kind: output, shape index: {2}]  }
   0x1   :  { %2782 = sst [smem:[#allocation53_spill]] %s2767_s2  ;;  %s1820_s15 = scalar_lea.hbm %s2765_s0, 16 }
   0x2   :  { %2783 = sst [smem:[#allocation54_spill]] %s2769_s4  ;;  %p1821_p0 = scmp.ne.s32.totalorder %s2765_s0, %s1820_s15 }
   0x3   :  { %2784 = sst [smem:[#allocation55_spill]] %s2771_s6  ;;  %p1824_p1 = scmp.lt.u32.totalorder %s1820_s15, %s2765_s0 }
   0x5   :  { %p1826_p2 = pnand %p1824_p1, %p1821_p0 }
   0x7   :  { %1829 = shalt.err (!%p1826_p2)  }
   0x8   :  { %s2256_s20 = smov [#allocation8]  }
   0x9   :  { %17 = dma.hbm_to_smem %s2765_s0, 16, %s2256_s20, [#allocation7] }
   0xa   :  { %2202 = dma.done.wait [#allocation7], 16 }
   0xb   :  { %2203 = vsyncadd [#allocation7], 4294967280 }
   0xc   :  { %19 = sfence }
   0xd   :  { %20 = vsyncpa [#allocation10], 0 }
   0xe   :  { %21 = vsyncpa [#allocation13], 0 }
   0xf   :  { %22 = vsyncpa [#allocation11], 0 }
  0x10   :  { %23 = vsyncpa [#allocation17], 0  ;;  %s2346_s23 = smov 0   ;;  %s2348_s24 = smov 0  }
  0x11   :  { %s2350_s25 = smov 0   ;;  %s2352_s26 = smov 0  }
  0x12 LB: > { %s2365_s0 = sadd.s32 4294967295, %s2254_s26   ;;  %s2368_s27 = sadd.s32 1, %s2254_s26   ;;  %s2254_s26 = sphi %s2352_s26, %s2804_s26   ;;  %s2250_s25 = sphi %s2350_s25, %s2808_s25   ;;  %s2246_s24 = sphi %s2348_s24, %s2807_s24   ;;  %s2242_s23 = sphi %s2346_s23, %s2806_s23  }
  0x13   : > { %2785 = sst [smem:[#allocation51_spill]] %s2368_s27  ;;  %s117_s28 = ssub.s32 %s2254_s26, %s2368_s27 }
  0x14   : > { %s120_s29 = sadd.s32 1, %s2250_s25  ;;  %p118_p3 = scmp.eq.s32.totalorder %s117_s28, 0 }
  0x15   : > { %p127_p4 = scmp.ne.s32.totalorder %s2250_s25, %s2246_s24  ;;  %p128_p5 = scmp.eq.s32.totalorder %s2254_s26, 0 }
  0x16   : > { %p133_p6 = scmp.ne.s32.totalorder %s2246_s24, %s2242_s23  ;;  %p2776_p8 = scmp.eq.s32.totalorder %s2365_s0, 0 }
  0x17   : > { %s2378_s30 = scalar_select %p118_p3, %s2250_s25, %s120_s29  }
  0x18   : > { %p2380_p7 = por %p128_p5, %p127_p4  ;;  %p1445_p9 = scmp.ge.s32.totalorder %s2254_s26, 1 }
  0x19   : > { %2786 = sst [smem:[#allocation52_spill]] %s2378_s30  ;;  %p233_p10 = scmp.lt.s32.totalorder %s2254_s26, 3 }
  0x1a   : > { %p2389_p11 = por %p2776_p8, %p133_p6  ;;  %s2257_s14 = smov [#allocation9]  }
  0x1b   : > { %p2394_p13 = pnand %p1445_p9, %p233_p10  ;;  %s246_s15 = sshll.u32 %s2257_s14, 4  ;;  %s247_s15 = int_to_ptr.vmem [resolvable:$true] %s246_s15 }
  0x1c   : > { %s2788_s12 = scalar_select %p2389_p11, 1, 0 }
  0x1d   : > { %s2789_s13 = scalar_select %p2394_p13, 1, 0 }
  0x1e   : > { %p1598_p0 = pneg %p2394_p13  ;;  %p1611_p1 = scmp.lt.s32.totalorder %s2254_s26, 2 }
  0x1f   : > { %s2258_s17 = smov [#allocation12]   ;;  %s2792_s2 = sld [smem:[#allocation53_spill]] }
  0x20   : > { %p2403_p2 = pnand %p1598_p0, %p2776_p8  ;;  %s259_s18 = sshll.u32 %s2258_s17, 4  ;;  %s2413_s18 = int_to_ptr.vmem [resolvable:$true] %s259_s18 }
  0x21   : > { %p2409_p3 = pnand %p1611_p1, %p2380_p7 }
  0x22   : > { %p1832_p5 = pneg %p2403_p2 }
  0x23   : > { %s2791_s19 = scalar_select %p2409_p3, 1, 0 }
  0x25   : > { %s1830_s22 = scalar_lea.hbm %s2792_s2, 128 }
  0x26   : > { %p1831_p4 = scmp.ne.s32.totalorder %s2792_s2, %s1830_s22  ;;  %p1837_p7 = scmp.lt.u32.totalorder %s1830_s22, %s2792_s2 }
  0x28   : > { %p1833_p6 = pnand %p1832_p5, %p1831_p4 }
  0x2a   : > { %p1834_p9 = pneg %p1833_p6 }
  0x2c   : > { %p1839_p10 = pnand %p1837_p7, %p1834_p9 }
  0x2e   : > { %1842 = shalt.err (!%p1839_p10)
}
  0x2f   : > { %s1843_s14 = scalar_lea.vmem %s247_s15, 128  ;;  %p1851_p8 = scmp.lt.s32.totalorder %s247_s15, %s247_s15 }
  0x30   : > { %p1844_p0 = scmp.ne.s32.totalorder %s247_s15, %s1843_s14  ;;  %p1852_p11 = scmp.lt.s32.totalorder %s1843_s14, %s1843_s14 }
  0x32   : > { %p1846_p1 = pnand %p1844_p0, %p1832_p5  ;;  %p1853_p13 = por %p1852_p11, %p1851_p8 }
  0x34   : > { %p1847_p12 = pneg %p1846_p1 }
  0x36   : > { %p1854_p3 = pnand %p1853_p13, %p1847_p12 }
  0x38   : > { %1857 = shalt.err (!%p1854_p3)
}
  0x39   : > { %1601 = dma.hbm_to_vmem [thread:$0]  (!%p2403_p2), %s2792_s2, 128, %s247_s15, [#allocation10]  }
  0x3a   : > { %s2793_s4 = sld [smem:[#allocation54_spill]] }
  0x40   : > { %s1858_s23 = scalar_lea.hbm %s2793_s4, 8192 }
  0x41   : > { %p1859_p4 = scmp.ne.s32.totalorder %s2793_s4, %s1858_s23  ;;  %p1865_p12 = scmp.lt.u32.totalorder %s1858_s23, %s2793_s4 }
  0x43   : > { %p1861_p8 = pnand %p1859_p4, %p1832_p5 }
  0x45   : > { %p1862_p11 = pneg %p1861_p8 }
  0x47   : > { %p1867_p13 = pnand %p1865_p12, %p1862_p11 }
  0x49   : > { %1870 = shalt.err (!%p1867_p13)
}
  0x4a   : > { %s1871_s15 = scalar_lea.vmem %s2413_s18, 8192  ;;  %p1879_p7 = scmp.lt.s32.totalorder %s2413_s18, %s2413_s18 }
  0x4b   : > { %p1872_p3 = scmp.ne.s32.totalorder %s2413_s18, %s1871_s15  ;;  %p1880_p10 = scmp.lt.s32.totalorder %s1871_s15, %s1871_s15 }
  0x4d   : > { %p1874_p6 = pnand %p1872_p3, %p1832_p5  ;;  %p1881_p0 = por %p1880_p10, %p1879_p7 }
  0x4f   : > { %p1875_p9 = pneg %p1874_p6 }
  0x51   : > { %p1882_p1 = pnand %p1881_p0, %p1875_p9 }
  0x53   : > { %1885 = shalt.err (!%p1882_p1)
}
  0x54   : > { %s2259_s17 = smov 256   ;;  %s2260_s20 = smov 16  }
  0x55   : > { %1604 = dma.hbm_to_vmem [thread:$0]  (!%p2403_p2), %s2793_s4, 8192, %s2413_s18, [#allocation13], %s2259_s17, %s2259_s17, %s2260_s20  }
  0x56   : > { %s276_s23 = sand.u32 1, %s2254_s26   ;;  %s278_s28 = sand.u32 1, %s2250_s25  }
  0x57   : > { %s1449_s29 = sshll.u32 %s278_s28, 7  ;;  %s1575_s11 = sshll.u32 %s2254_s26, 7 }
  0x58   : > { %s2794_s6 = sld [smem:[#allocation55_spill]]  ;;  %s280_s16 = scalar_lea.vmem [#allocation14], %s1449_s29 }
  0x59   : > { %s287_s30 = sshll.u32 %s280_s16, 4  ;;  %s2474_s27 = scalar_lea.sflag [#allocation10], %s276_s23  ;;  %s2472_s30 = int_to_ptr.vmem [resolvable:$true] %s287_s30 }
  0x5a   : > { %p2795_p5 = scmp.ne.s32.totalorder %s2791_s19, 0 }
  0x5c   : > { %p1888_p4 = pneg %p2795_p5 }
  0x5e   : > { %s2470_s2 = scalar_lea.hbm %s2794_s6, %s1575_s11  ;;  %s1891_s21 = scalar_lea.hbm %s2794_s6, 4096 }
  0x5f   : > { %s1886_s18 = scalar_lea.hbm %s2470_s2, 2048  ;;  %p1892_p12 = scmp.lt.u32.totalorder %s2470_s2, %s2794_s6 }
  0x60   : > { %p1887_p2 = scmp.ne.s32.totalorder %s2470_s2, %s1886_s18  ;;  %p1893_p13 = scmp.lt.u32.totalorder %s1891_s21, %s1886_s18 }
  0x61   : > { %p1895_p6 = scmp.lt.u32.totalorder %s1886_s18, %s2470_s2 }
  0x62   : > { %p1889_p8 = pnand %p1888_p4, %p1887_p2  ;;  %p1894_p3 = por %p1893_p13, %p1892_p12 }
  0x64   : > { %p1890_p11 = pneg %p1889_p8  ;;  %p1896_p9 = por %p1895_p6, %p1894_p3 }
  0x66   : > { %p1897_p7 = pnand %p1896_p9, %p1890_p11 }
  0x68   : > { %1900 = shalt.err (!%p1897_p7)
}
  0x69   : > { %s1901_s23 = scalar_lea.vmem %s2472_s30, 2048  ;;  %s2261_s29 = smov [#allocation14]  }
  0x6a   : > { %p1902_p10 = scmp.ne.s32.totalorder %s2472_s30, %s1901_s23  ;;  %s1906_s11 = sshll.u32 %s2261_s29, 4  ;;  %s1907_s11 = int_to_ptr.vmem [resolvable:$false] %s1906_s11 }
  0x6b   : > { %s1908_s14 = scalar_lea.vmem %s1907_s11, 4096  ;;  %p1909_p2 = scmp.lt.s32.totalorder %s2472_s30, %s1907_s11 }
  0x6c   : > { %p1904_p0 = pnand %p1902_p10, %p1888_p4  ;;  %p1910_p8 = scmp.lt.s32.totalorder %s1908_s14, %s1901_s23 }
  0x6e   : > { %p1905_p1 = pneg %p1904_p0  ;;  %p1911_p12 = por %p1910_p8, %p1909_p2 }
  0x70   : > { %p1912_p13 = pnand %p1911_p12, %p1905_p1 }
  0x72   : > { %1915 = shalt.err (!%p1912_p13)
}
  0x73   : > { %s2262_s15 = smov 128   ;;  %s2263_s16 = smov 8  }
  0x74   : > { %1608 = dma.hbm_to_vmem [thread:$0]  (!%p2795_p5), %s2470_s2, 2048, %s2472_s30, %s2474_s27, %s2259_s17, %s2262_s15, %s2263_s16  }
  0x75   : > { %p2796_p4 = scmp.ne.s32.totalorder %s2789_s13, 0 }
  0x76   : > { %p2797_p11 = scmp.eq.s32.totalorder (!%p2796_p4), %s2365_s0, 0 }
  0x77   : > { %307 = sbr.rel (%p2796_p4) target bundleno = 1567 (0x61f), region = 44 }
  0x7e   : > { %2205 = dma.done.wait (%p2797_p11), [#allocation10], 128   ;;  %p2798_p3 = pmov %p2797_p11 }
  0x80   : > { %2207 = vsyncadd (%p2798_p3), [#allocation10], 4294967168  ;;  %p2799_p6 = pmov %p2798_p3 }
  0x81   : > { %p2800_p9 = pmov %p2798_p3 }
  0x82   : > { %2209 = dma.done.wait (%p2799_p6), [#allocation13], 8192  }
  0x83   : > { %2211 = vsyncadd (%p2800_p9), [#allocation13], 4294959104  ;;  %s317_s19 = sand.u32 1, %s2365_s0   ;;  %s319_s2 = sand.u32 1, %s2246_s24  }
  0x84   : > { %s1455_s27 = sshll.u32 %s319_s2, 7  ;;  %s318_s30 = scalar_lea.sflag [#allocation10], %s317_s19 }
  0x85   : > { %s2515_s13 = scalar_lea.vmem [#allocation14], %s1455_s27  ;;  %p2801_p5 = scmp.ne.s32.totalorder %s2788_s12, 0 }
  0x87   : > { %2213 = dma.done.wait (%p2801_p5), %s318_s30, 2048  }
  0x88   : > { %2215 = vsyncadd (%p2801_p5), %s318_s30, 4294965248  ;;  %s1456_s17 = sshll.u32 %s2365_s0, 1  ;;  %p2802_p10 = scmp.ne.s32.totalorder %s2365_s0, 0 }
  0x89   : > { %p355_p7 = scmp.lt.s32.totalorder %s1456_s17, 3  ;;  %s364_s21 = sld [smem:[#allocation8]] (!%p2802_p10) }
  0x8a   : > { %363 = sbr.rel (%p2802_p10) target bundleno = 656 (0x290), region = 60  ;;  %s2264_s22 = smov (!%p2802_p10), [#allocation2]  }
  0x8b   : > { %s2810_s17 = smov (!%p355_p7, %s1456_s17), 3  ;;  %s374_s28 = sshll.u32 (!%p2802_p10), %s2264_s22, 4  ;;  %s2532_s28 = int_to_ptr.vmem [resolvable:$true] %s374_s28 }
  0x8c   : > { %s2530_s23 = sld [smem:[#allocation8 + $0x1]] (!%p2802_p10)  ;;  %s2265_s12 = smov (!%p2802_p10), [#allocation2 + $0x1]  }
  0x8d   : > { %s390_s29 = sshll.u32 (!%p2802_p10), %s2265_s12, 4  ;;  %s2534_s11 = sld [smem:[#allocation8 + $0x2]] (!%p2802_p10)  ;;  %s2536_s29 = int_to_ptr.vmem [resolvable:$true] %s390_s29 }
  0x8e   : > { %s2266_s14 = smov (!%p2802_p10), [#allocation2 + $0x2]   ;;  %s2538_s16 = sld [smem:[#allocation8 + $0x3]] (!%p2802_p10) }
  0x8f   : > { %s406_s15 = sshll.u32 (!%p2802_p10), %s2266_s14, 4  ;;  %s1458_s19 = sshll.u32 (!%p2802_p10), %s364_s21, 4  ;;  %s2540_s15 = int_to_ptr.vmem [resolvable:$true] %s406_s15 }
  0x90   : > { %s366_s30 = scalar_lea.hbm (!%p2802_p10), %s2766_s1, %s1458_s19  ;;  %s2549_s20 = scalar_lea.hbm (!%p2802_p10), %s2766_s1, 4864 }
  0x91   : > { %s1916_s26 = scalar_lea.hbm %s366_s30, 16  ;;  %p1919_p1 = scmp.lt.u32.totalorder %s366_s30, %s2766_s1 }
  0x92   : > { %s1460_s18 = sshll.u32 %s2530_s23, 4  ;;  %p1917_p0 = scmp.ne.s32.totalorder %s366_s30, %s1916_s26 }
  0x93   : > { %p1920_p2 = scmp.lt.u32.totalorder %s2549_s20, %s1916_s26  ;;  %p1922_p12 = scmp.lt.u32.totalorder %s1916_s26, %s366_s30 }
  0x95   : > { %p1921_p8 = por %p1920_p2, %p1919_p1 }
  0x97   : > { %p1923_p13 = por %p1922_p12, %p1921_p8 }
  0x99   : > { %p1924_p4 = pnand %p1923_p13, %p1917_p0 }
  0x9b   : > { %1927 = shalt.err (!%p1924_p4)  }
  0x9c   : > { %s1928_s21 = scalar_lea.vmem %s2532_s28, 16  ;;  %s2558_s23 = scalar_lea.vmem %s2532_s28, 128 }
  0x9d   : > { %p1929_p11 = scmp.ne.s32.totalorder %s2532_s28, %s1928_s21  ;;  %p1933_p3 = scmp.lt.s32.totalorder %s2532_s28, %s2532_s28 }
  0x9e   : > { %p1934_p6 = scmp.lt.s32.totalorder %s2558_s23, %s1928_s21 }
  0xa0   : > { %p1935_p9 = por %p1934_p6, %p1933_p3 }
  0xa2   : > { %p1936_p5 = pnand %p1935_p9, %p1929_p11 }
  0xa4   : > { %1939 = shalt.err (!%p1936_p5)  }
  0xa5   : > { %377 = dma.hbm_to_vmem [thread:$0]  %s366_s30, 16, %s2532_s28, [#allocation6] }
  0xa6   : > { %s380_s14 = scalar_lea.hbm %s2766_s1, %s1460_s18  ;;  %s1462_s19 = sshll.u32 %s2534_s11, 4 }
  0xa7   : > { %s1940_s2 = scalar_lea.hbm %s380_s14, 16  ;;  %p1943_p10 = scmp.lt.u32.totalorder %s380_s14, %s2766_s1 }
  0xa8   : > { %p1941_p7 = scmp.ne.s32.totalorder %s380_s14, %s1940_s2  ;;  %p1944_p0 = scmp.lt.u32.totalorder %s2549_s20, %s1940_s2 }
  0xa9   : > { %p1946_p2 = scmp.lt.u32.totalorder %s1940_s2, %s380_s14 }
  0xaa   : > { %p1945_p1 = por %p1944_p0, %p1943_p10 }
  0xac   : > { %p1947_p8 = por %p1946_p2, %p1945_p1 }
  0xae   : > { %p1948_p12 = pnand %p1947_p8, %p1941_p7 }
  0xb0   : > { %1951 = shalt.err (!%p1948_p12)  }
  0xb1   : > { %s1952_s30 = scalar_lea.vmem %s2536_s29, 16  ;;  %p1957_p4 = scmp.lt.s32.totalorder %s2536_s29, %s2532_s28 }
  0xb2   : > { %p1953_p13 = scmp.ne.s32.totalorder %s2536_s29, %s1952_s30  ;;  %p1958_p11 = scmp.lt.s32.totalorder %s2558_s23, %s1952_s30 }
  0xb4   : > { %p1959_p3 = por %p1958_p11, %p1957_p4 }
  0xb6   : > { %p1960_p6 = pnand %p1959_p3, %p1953_p13 }
  0xb8   : > { %1963 = shalt.err (!%p1960_p6)  }
  0xb9   : > { %393 = dma.hbm_to_vmem [thread:$0]  %s380_s14, 16, %s2536_s29, [#allocation6 + $0x1] }
  0xba   : > { %s396_s22 = scalar_lea.hbm %s2766_s1, %s1462_s19  ;;  %s1464_s12 = sshll.u32 %s2538_s16, 4 }
  0xbb   : > { %s1964_s21 = scalar_lea.hbm %s396_s22, 16  ;;  %p1967_p5 = scmp.lt.u32.totalorder %s396_s22, %s2766_s1 }
  0xbc   : > { %p1965_p9 = scmp.ne.s32.totalorder %s396_s22, %s1964_s21  ;;  %p1968_p7 = scmp.lt.u32.totalorder %s2549_s20, %s1964_s21 }
  0xbd   : > { %p1970_p0 = scmp.lt.u32.totalorder %s1964_s21, %s396_s22 }
  0xbe   : > { %p1969_p10 = por %p1968_p7, %p1967_p5 }
  0xc0   : > { %p1971_p1 = por %p1970_p0, %p1969_p10 }
  0xc2   : > { %p1972_p2 = pnand %p1971_p1, %p1965_p9 }
  0xc4   : > { %1975 = shalt.err (!%p1972_p2)  }
  0xc5   : > { %s1976_s29 = scalar_lea.vmem %s2540_s15, 16  ;;  %p1981_p12 = scmp.lt.s32.totalorder %s2540_s15, %s2532_s28 }
  0xc6   : > { %p1977_p8 = scmp.ne.s32.totalorder %s2540_s15, %s1976_s29  ;;  %p1982_p13 = scmp.lt.s32.totalorder %s2558_s23, %s1976_s29 }
  0xc8   : > { %p1983_p4 = por %p1982_p13, %p1981_p12 }
  0xca   : > { %p1984_p11 = pnand %p1983_p4, %p1977_p8 }
  0xcc   : > { %1987 = shalt.err (!%p1984_p11)  }
  0xcd   : > { %409 = dma.hbm_to_vmem [thread:$0]  %s396_s22, 16, %s2540_s15, [#allocation6 + $0x2] }
  0xce   : > { %s412_s19 = scalar_lea.hbm %s2766_s1, %s1464_s12  ;;  %s2267_s2 = smov [#allocation2 + $0x3]  }
  0xcf   : > { %s422_s27 = sshll.u32 %s2267_s2, 4  ;;  %s2595_s26 = sld [smem:[#allocation8 + $0x4]]  ;;  %s423_s27 = int_to_ptr.vmem [resolvable:$true] %s422_s27 }
  0xd0   : > { %s1988_s30 = scalar_lea.hbm %s412_s19, 16  ;;  %p1991_p6 = scmp.lt.u32.totalorder %s412_s19, %s2766_s1 }
  0xd1   : > { %p1989_p3 = scmp.ne.s32.totalorder %s412_s19, %s1988_s30  ;;  %p1992_p9 = scmp.lt.u32.totalorder %s2549_s20, %s1988_s30 }
  0xd2   : > { %p1994_p7 = scmp.lt.u32.totalorder %s1988_s30, %s412_s19 }
  0xd3   : > { %p1993_p5 = por %p1992_p9, %p1991_p6 }
  0xd5   : > { %p1995_p10 = por %p1994_p7, %p1993_p5 }
  0xd7   : > { %p1996_p0 = pnand %p1995_p10, %p1989_p3 }
  0xd9   : > { %1999 = shalt.err (!%p1996_p0)  }
  0xda   : > { %s2000_s15 = scalar_lea.vmem %s423_s27, 16  ;;  %p2005_p2 = scmp.lt.s32.totalorder %s423_s27, %s2532_s28 }
  0xdb   : > { %p2001_p1 = scmp.ne.s32.totalorder %s423_s27, %s2000_s15  ;;  %p2006_p8 = scmp.lt.s32.totalorder %s2558_s23, %s2000_s15 }
  0xdd   : > { %p2007_p12 = por %p2006_p8, %p2005_p2 }
  0xdf   : > { %p2008_p13 = pnand %p2007_p12, %p2001_p1 }
  0xe1   : > { %2011 = shalt.err (!%p2008_p13)  }
  0xe2   : > { %425 = dma.hbm_to_vmem [thread:$0]  %s412_s19, 16, %s423_s27, [#allocation6 + $0x3] }
  0xe3   : > { %s2268_s22 = smov [#allocation2 + $0x4]   ;;  %s2603_s21 = sld [smem:[#allocation8 + $0x5]] }
  0xe4   : > { %s438_s12 = sshll.u32 %s2268_s22, 4  ;;  %s2269_s4 = smov [#allocation2 + $0x5]   ;;  %s439_s12 = int_to_ptr.vmem [resolvable:$true] %s438_s12 }
  0xe5   : > { %s454_s6 = sshll.u32 %s2269_s4, 4  ;;  %s2605_s29 = sld [smem:[#allocation8 + $0x6]]  ;;  %s2608_s6 = int_to_ptr.vmem [resolvable:$true] %s454_s6 }
  0xe6   : > { %s1466_s16 = sshll.u32 %s2595_s26, 4 }
  0xe7   : > { %s428_s30 = scalar_lea.hbm %s2766_s1, %s1466_s16 }
  0xe8   : > { %s2012_s11 = scalar_lea.hbm %s428_s30, 16  ;;  %p2015_p11 = scmp.lt.u32.totalorder %s428_s30, %s2766_s1 }
  0xe9   : > { %p2013_p4 = scmp.ne.s32.totalorder %s428_s30, %s2012_s11  ;;  %p2016_p3 = scmp.lt.u32.totalorder %s2549_s20, %s2012_s11 }
  0xea   : > { %p2018_p9 = scmp.lt.u32.totalorder %s2012_s11, %s428_s30 }
  0xeb   : > { %p2017_p6 = por %p2016_p3, %p2015_p11 }
  0xed   : > { %p2019_p5 = por %p2018_p9, %p2017_p6 }
  0xef   : > { %p2020_p7 = pnand %p2019_p5, %p2013_p4 }
  0xf1   : > { %2023 = shalt.err (!%p2020_p7)  }
  0xf2   : > { %s2024_s18 = scalar_lea.vmem %s439_s12, 16  ;;  %p2029_p0 = scmp.lt.s32.totalorder %s439_s12, %s2532_s28 }
  0xf3   : > { %p2025_p10 = scmp.ne.s32.totalorder %s439_s12, %s2024_s18  ;;  %p2030_p1 = scmp.lt.s32.totalorder %s2558_s23, %s2024_s18 }
  0xf5   : > { %p2031_p2 = por %p2030_p1, %p2029_p0 }
  0xf7   : > { %p2032_p8 = pnand %p2031_p2, %p2025_p10 }
  0xf9   : > { %2035 = shalt.err (!%p2032_p8)  }
  0xfa   : > { %441 = dma.hbm_to_vmem [thread:$0]  %s428_s30, 16, %s439_s12, [#allocation6 + $0x4] }
  0xfb   : > { %s1468_s26 = sshll.u32 %s2603_s21, 4  ;;  %s2270_s15 = smov [#allocation2 + $0x6]  }
  0xfc   : > { %s470_s22 = sshll.u32 %s2270_s15, 4  ;;  %s444_s14 = scalar_lea.hbm %s2766_s1, %s1468_s26  ;;  %s2623_s22 = int_to_ptr.vmem [resolvable:$true] %s470_s22 }
  0xfd   : > { %s2036_s2 = scalar_lea.hbm %s444_s14, 16  ;;  %p2039_p13 = scmp.lt.u32.totalorder %s444_s14, %s2766_s1 }
  0xfe   : > { %p2037_p12 = scmp.ne.s32.totalorder %s444_s14, %s2036_s2  ;;  %p2040_p4 = scmp.lt.u32.totalorder %s2549_s20, %s2036_s2 }
  0xff   : > { %p2042_p3 = scmp.lt.u32.totalorder %s2036_s2, %s444_s14 }
 0x100   : > { %p2041_p11 = por %p2040_p4, %p2039_p13 }
 0x102   : > { %p2043_p6 = por %p2042_p3, %p2041_p11 }
 0x104   : > { %p2044_p9 = pnand %p2043_p6, %p2037_p12 }
 0x106   : > { %2047 = shalt.err (!%p2044_p9)  }
 0x107   : > { %s2048_s12 = scalar_lea.vmem %s2608_s6, 16  ;;  %p2053_p7 = scmp.lt.s32.totalorder %s2608_s6, %s2532_s28 }
 0x108   : > { %p2049_p5 = scmp.ne.s32.totalorder %s2608_s6, %s2048_s12  ;;  %p2054_p10 = scmp.lt.s32.totalorder %s2558_s23, %s2048_s12 }
 0x10a   : > { %p2055_p0 = por %p2054_p10, %p2053_p7 }
 0x10c   : > { %p2056_p1 = pnand %p2055_p0, %p2049_p5 }
 0x10e   : > { %2059 = shalt.err (!%p2056_p1)  }
 0x10f   : > { %457 = dma.hbm_to_vmem [thread:$0]  %s444_s14, 16, %s2608_s6, [#allocation6 + $0x5] }
 0x110   : > { %s1470_s21 = sshll.u32 %s2605_s29, 4  ;;  %s1471_s30 = sld [smem:[#allocation8 + $0x7]] }
 0x111   : > { %s460_s26 = scalar_lea.hbm %s2766_s1, %s1470_s21 }
 0x112   : > { %s2060_s15 = scalar_lea.hbm %s460_s26, 16  ;;  %p2063_p8 = scmp.lt.u32.totalorder %s460_s26, %s2766_s1 }
 0x113   : > { %p2061_p2 = scmp.ne.s32.totalorder %s460_s26, %s2060_s15  ;;  %p2064_p12 = scmp.lt.u32.totalorder %s2549_s20, %s2060_s15 }
 0x114   : > { %p2066_p4 = scmp.lt.u32.totalorder %s2060_s15, %s460_s26 }
 0x115   : > { %p2065_p13 = por %p2064_p12, %p2063_p8 }
 0x117   : > { %p2067_p11 = por %p2066_p4, %p2065_p13 }
 0x119   : > { %p2068_p3 = pnand %p2067_p11, %p2061_p2 }
 0x11b   : > { %2071 = shalt.err (!%p2068_p3)  }
 0x11c   : > { %s2072_s6 = scalar_lea.vmem %s2623_s22, 16  ;;  %p2077_p9 = scmp.lt.s32.totalorder %s2623_s22, %s2532_s28 }
 0x11d   : > { %p2073_p6 = scmp.ne.s32.totalorder %s2623_s22, %s2072_s6  ;;  %p2078_p5 = scmp.lt.s32.totalorder %s2558_s23, %s2072_s6 }
 0x11f   : > { %p2079_p7 = por %p2078_p5, %p2077_p9 }
 0x121   : > { %p2080_p10 = pnand %p2079_p7, %p2073_p6 }
 0x123   : > { %2083 = shalt.err (!%p2080_p10)  }
 0x124   : > { %473 = dma.hbm_to_vmem [thread:$0]  %s460_s26, 16, %s2623_s22, [#allocation6 + $0x6] }
 0x125   : > { %s2271_s29 = smov [#allocation2 + $0x7]   ;;  %s1472_s2 = sshll.u32 %s1471_s30, 4 }
 0x126   : > { %s486_s14 = sshll.u32 %s2271_s29, 4  ;;  %s476_s12 = scalar_lea.hbm %s2766_s1, %s1472_s2  ;;  %s487_s14 = int_to_ptr.vmem [resolvable:$true] %s486_s14 }
 0x127   : > { %s2084_s21 = scalar_lea.hbm %s476_s12, 16  ;;  %p2087_p1 = scmp.lt.u32.totalorder %s476_s12, %s2766_s1 }
 0x128   : > { %p2085_p0 = scmp.ne.s32.totalorder %s476_s12, %s2084_s21  ;;  %p2088_p2 = scmp.lt.u32.totalorder %s2549_s20, %s2084_s21 }
 0x129   : > { %p2090_p12 = scmp.lt.u32.totalorder %s2084_s21, %s476_s12 }
 0x12a   : > { %p2089_p8 = por %p2088_p2, %p2087_p1 }
 0x12c   : > { %p2091_p13 = por %p2090_p12, %p2089_p8 }
 0x12e   : > { %p2092_p4 = pnand %p2091_p13, %p2085_p0 }
 0x130   : > { %2095 = shalt.err (!%p2092_p4)  }
 0x131   : > { %s2096_s22 = scalar_lea.vmem %s487_s14, 16  ;;  %p2101_p3 = scmp.lt.s32.totalorder %s487_s14, %s2532_s28 }
 0x132   : > { %p2097_p11 = scmp.ne.s32.totalorder %s487_s14, %s2096_s22  ;;  %p2102_p6 = scmp.lt.s32.totalorder %s2558_s23, %s2096_s22 }
 0x134   : > { %p2103_p9 = por %p2102_p6, %p2101_p3 }
 0x136   : > { %p2104_p5 = pnand %p2103_p9, %p2097_p11 }
 0x138   : > { %2107 = shalt.err (!%p2104_p5)  }
 0x139   : > { %489 = dma.hbm_to_vmem [thread:$0]  %s476_s12, 16, %s487_s14, [#allocation6 + $0x7] }
 0x13a   : > { %2216 = dma.done.wait [#allocation6], 16 }
 0x13b   : > { %2217 = vsyncadd [#allocation6], 4294967280 }
 0x13c   : > { %2218 = dma.done.wait [#allocation6 + $0x1], 16 }
 0x13d   : > { %2219 = vsyncadd [#allocation6 + $0x1], 4294967280 }
 0x13e   : > { %2220 = dma.done.wait [#allocation6 + $0x2], 16 }
 0x13f   : > { %2221 = vsyncadd [#allocation6 + $0x2], 4294967280 }
 0x140   : > { %2222 = dma.done.wait [#allocation6 + $0x3], 16 }
 0x141   : > { %2223 = vsyncadd [#allocation6 + $0x3], 4294967280 }
 0x142   : > { %2224 = dma.done.wait [#allocation6 + $0x4], 16 }
 0x143   : > { %2225 = vsyncadd [#allocation6 + $0x4], 4294967280 }
 0x144   : > { %2226 = dma.done.wait [#allocation6 + $0x5], 16 }
 0x145   : > { %2227 = vsyncadd [#allocation6 + $0x5], 4294967280 }
 0x146   : > { %2228 = dma.done.wait [#allocation6 + $0x6], 16 }
 0x147   : > { %2229 = vsyncadd [#allocation6 + $0x6], 4294967280 }
 0x148   : > { %2230 = dma.done.wait [#allocation6 + $0x7], 16 }
 0x149   : > { %2231 = vsyncadd [#allocation6 + $0x7], 4294967280  ;;  %vm1029_vm0 = vcmask 7168   ;;  %v2272_v0 = vmov -inf   ;;  %v2273_v1 = vmov 0.0   ;;  %v509_v42 = vld [vmem:[#allocation9] sm:$0xff] }
 0x14a   : > { %1030 = vst.msk [vmem:[#allocation4] sm:$0xff] %vm1029_vm0, %v2272_v0  ;;  %1031 = vst.msk [vmem:[#allocation5] sm:$0xff] %vm1029_vm0, %v2273_v1  ;;  %v1674_v2 = vld [vmem:[#allocation12 + $0x4] ss:$16 sps:$4 sm:$0xff]   ;;  %v1676_v3 = vld [vmem:[#allocation12] ss:$16 sps:$4 sm:$0xff]   ;;  %v511_v44 = vpack.c.bf16 %v509_v42, %v509_v42 }
 0x14b   : > { %918 = vmatprep.subr.bf16.mxu0 %v1674_v2  ;;  %v1677_v4 = vld [vmem:[#allocation12 + $0x24] ss:$16 sps:$4 sm:$0xff]   ;;  %v1679_v5 = vld [vmem:[#allocation12 + $0x20] ss:$16 sps:$4 sm:$0xff]   ;;  %v1685_v7 = vld [vmem:[#allocation12 + $0xc] ss:$16 sps:$4 sm:$0xff]  }
 0x14c   : > { %919 = vmatpush1.bf16.msra.mxu0 %v1676_v3  ;;  %v1680_v6 = vld [vmem:[#allocation12 + $0x44] ss:$16 sps:$4 sm:$0xff]   ;;  %v1688_v8 = vld [vmem:[#allocation12 + $0x8] ss:$16 sps:$4 sm:$0xff]   ;;  %v1682_v9 = vld [vmem:[#allocation12 + $0x40] ss:$16 sps:$4 sm:$0xff]   ;;  %959 = vmatprep.subr.bf16.mxu1 %v1685_v7  ;;  %v578_v7 = vlaneseq }
 0x14d   : > { %920 = vmatprep.subr.bf16.mxu0 %v1677_v4  ;;  %v1683_v10 = vld [vmem:[#allocation12 + $0x64] ss:$16 sps:$4 sm:$0xff]   ;;  %960 = vmatpush1.bf16.msra.mxu1 %v1688_v8  ;;  %v1691_v11 = vld [vmem:[#allocation12 + $0x2c] ss:$16 sps:$4 sm:$0xff]   ;;  %v1694_v12 = vld [vmem:[#allocation12 + $0x28] ss:$16 sps:$4 sm:$0xff]  }
 0x14e   : > { %961 = vmatprep.subr.bf16.mxu1 %v1691_v11  ;;  %v1687_v13 = vld [vmem:[#allocation12 + $0x60] ss:$16 sps:$4 sm:$0xff]   ;;  %v1689_v14 = vld [vmem:[#allocation12 + $0x84] ss:$16 sps:$4 sm:$0xff]   ;;  %v1697_v15 = vld [vmem:[#allocation12 + $0x4c] ss:$16 sps:$4 sm:$0xff]   ;;  %950 = vmatprep.mubr.bf16.mxu0 %v511_v44 }
 0x14f   : > { %v1700_v16 = vld [vmem:[#allocation12 + $0x48] ss:$16 sps:$4 sm:$0xff]   ;;  %v1703_v17 = vld [vmem:[#allocation12 + $0x6c] ss:$16 sps:$4 sm:$0xff]   ;;  %v1693_v18 = vld [vmem:[#allocation12 + $0x80] ss:$16 sps:$4 sm:$0xff]   ;;  %991 = vmatprep.mubr.bf16.mxu1 %v511_v44 }
 0x150   : > { %921 = vmatpush1.bf16.msra.mxu0 %v1679_v5  ;;  %v1695_v19 = vld [vmem:[#allocation12 + $0xa4] ss:$16 sps:$4 sm:$0xff]   ;;  %v1706_v20 = vld [vmem:[#allocation12 + $0x68] ss:$16 sps:$4 sm:$0xff]   ;;  %v1709_v21 = vld [vmem:[#allocation12 + $0x8c] ss:$16 sps:$4 sm:$0xff]  }
 0x151   : > { %922 = vmatprep.subr.bf16.mxu0 %v1680_v6  ;;  %962 = vmatpush1.bf16.msra.mxu1 %v1694_v12  ;;  %v1699_v22 = vld [vmem:[#allocation12 + $0xa0] ss:$16 sps:$4 sm:$0xff]   ;;  %v1701_v23 = vld [vmem:[#allocation12 + $0xc4] ss:$16 sps:$4 sm:$0xff]   ;;  %v1712_v24 = vld [vmem:[#allocation12 + $0x88] ss:$16 sps:$4 sm:$0xff]  }
 0x152   : > { %963 = vmatprep.subr.bf16.mxu1 %v1697_v15  ;;  %v1715_v25 = vld [vmem:[#allocation12 + $0xac] ss:$16 sps:$4 sm:$0xff]   ;;  %v1705_v26 = vld [vmem:[#allocation12 + $0xc0] ss:$16 sps:$4 sm:$0xff]   ;;  %v1707_v27 = vld [vmem:[#allocation12 + $0xe4] ss:$16 sps:$4 sm:$0xff]  }
 0x153   : > { %v1718_v28 = vld [vmem:[#allocation12 + $0xa8] ss:$16 sps:$4 sm:$0xff]   ;;  %v1721_v29 = vld [vmem:[#allocation12 + $0xcc] ss:$16 sps:$4 sm:$0xff]   ;;  %v1711_v30 = vld [vmem:[#allocation12 + $0xe0] ss:$16 sps:$4 sm:$0xff]  }
 0x154   : > { %923 = vmatpush1.bf16.msra.mxu0 %v1682_v9  ;;  %v1713_v31 = vld [vmem:[#allocation12 + $0x104] ss:$16 sps:$4 sm:$0xff]   ;;  %v1724_v32 = vld [vmem:[#allocation12 + $0xc8] ss:$16 sps:$4 sm:$0xff]   ;;  %v1727_v33 = vld [vmem:[#allocation12 + $0xec] ss:$16 sps:$4 sm:$0xff]  }
 0x155   : > { %924 = vmatprep.subr.bf16.mxu0 %v1683_v10  ;;  %964 = vmatpush1.bf16.msra.mxu1 %v1700_v16  ;;  %v1717_v34 = vld [vmem:[#allocation12 + $0x100] ss:$16 sps:$4 sm:$0xff]   ;;  %v1719_v35 = vld [vmem:[#allocation12 + $0x124] ss:$16 sps:$4 sm:$0xff]   ;;  %v1730_v36 = vld [vmem:[#allocation12 + $0xe8] ss:$16 sps:$4 sm:$0xff]  }
 0x156   : > { %965 = vmatprep.subr.bf16.mxu1 %v1703_v17  ;;  %v1733_v37 = vld [vmem:[#allocation12 + $0x10c] ss:$16 sps:$4 sm:$0xff]   ;;  %v1723_v38 = vld [vmem:[#allocation12 + $0x120] ss:$16 sps:$4 sm:$0xff]   ;;  %v1725_v39 = vld [vmem:[#allocation12 + $0x144] ss:$16 sps:$4 sm:$0xff]  }
 0x157   : > { %v1736_v40 = vld [vmem:[#allocation12 + $0x108] ss:$16 sps:$4 sm:$0xff]   ;;  %v1739_v41 = vld [vmem:[#allocation12 + $0x12c] ss:$16 sps:$4 sm:$0xff]   ;;  %v1729_v43 = vld [vmem:[#allocation12 + $0x140] ss:$16 sps:$4 sm:$0xff]  }
 0x158   : > { %925 = vmatpush1.bf16.msra.mxu0 %v1687_v13  ;;  %v1731_v45 = vld [vmem:[#allocation12 + $0x164] ss:$16 sps:$4 sm:$0xff]   ;;  %v1742_v46 = vld [vmem:[#allocation12 + $0x128] ss:$16 sps:$4 sm:$0xff]   ;;  %v1745_v47 = vld [vmem:[#allocation12 + $0x14c] ss:$16 sps:$4 sm:$0xff]  }
 0x159   : > { %926 = vmatprep.subr.bf16.mxu0 %v1689_v14  ;;  %966 = vmatpush1.bf16.msra.mxu1 %v1706_v20  ;;  %v1735_v48 = vld [vmem:[#allocation12 + $0x160] ss:$16 sps:$4 sm:$0xff]   ;;  %v1737_v49 = vld [vmem:[#allocation12 + $0x184] ss:$16 sps:$4 sm:$0xff]   ;;  %v1748_v50 = vld [vmem:[#allocation12 + $0x148] ss:$16 sps:$4 sm:$0xff]  }
 0x15a   : > { %967 = vmatprep.subr.bf16.mxu1 %v1709_v21  ;;  %v1751_v51 = vld [vmem:[#allocation12 + $0x16c] ss:$16 sps:$4 sm:$0xff]   ;;  %v1741_v52 = vld [vmem:[#allocation12 + $0x180] ss:$16 sps:$4 sm:$0xff]   ;;  %v1743_v53 = vld [vmem:[#allocation12 + $0x1a4] ss:$16 sps:$4 sm:$0xff]  }
 0x15b   : > { %v1754_v54 = vld [vmem:[#allocation12 + $0x168] ss:$16 sps:$4 sm:$0xff]   ;;  %v1757_v55 = vld [vmem:[#allocation12 + $0x18c] ss:$16 sps:$4 sm:$0xff]   ;;  %v1747_v56 = vld [vmem:[#allocation12 + $0x1a0] ss:$16 sps:$4 sm:$0xff]  }
 0x15c   : > { %927 = vmatpush1.bf16.msra.mxu0 %v1693_v18  ;;  %v1749_v57 = vld [vmem:[#allocation12 + $0x1c4] ss:$16 sps:$4 sm:$0xff]   ;;  %v1760_v58 = vld [vmem:[#allocation12 + $0x188] ss:$16 sps:$4 sm:$0xff]   ;;  %v1761_v59 = vld [vmem:[#allocation12 + $0x1ac] ss:$16 sps:$4 sm:$0xff]  }
 0x15d   : > { %928 = vmatprep.subr.bf16.mxu0 %v1695_v19  ;;  %968 = vmatpush1.bf16.msra.mxu1 %v1712_v24  ;;  %v1753_v60 = vld [vmem:[#allocation12 + $0x1c0] ss:$16 sps:$4 sm:$0xff]   ;;  %v1755_v62 = vld [vmem:[#allocation12 + $0x1e4] ss:$16 sps:$4 sm:$0xff]   ;;  %v1763_v63 = vld [vmem:[#allocation12 + $0x1a8] ss:$16 sps:$4 sm:$0xff]  }
 0x15e   : > { %969 = vmatprep.subr.bf16.mxu1 %v1715_v25  ;;  %v507_v61 = vld [vmem:[#allocation2] sm:$0xff]  ;;  %v1766_v3 = vld [vmem:[#allocation12 + $0x1c8] ss:$16 sps:$4 sm:$0xff]   ;;  %v579_v8 = vshrl.u32 %v578_v7, 7  ;;  %v576_v10 = vld [vmem:[%s2770_s5] sm:$0xf] }
 0x15f   : > { %v1764_v0 = vld [vmem:[#allocation12 + $0x1cc] ss:$16 sps:$4 sm:$0xff]   ;;  %v508_v1 = vmax.f32 %v507_v61, 0.0  ;;  %v1759_v2 = vld [vmem:[#allocation12 + $0x1e0] ss:$16 sps:$4 sm:$0xff]  }
 0x160   : > { %929 = vmatpush1.bf16.msra.mxu0 %v1699_v22  ;;  %v1767_v4 = vld [vmem:[#allocation12 + $0x1ec] ss:$16 sps:$4 sm:$0xff]   ;;  %v1769_v6 = vld [vmem:[#allocation12 + $0x1e8] ss:$16 sps:$4 sm:$0xff]   ;;  %v580_v9 = vsub.s32 0, %v579_v8  ;;  %v584_v11 = vsub.s32 1, %v579_v8 }
 0x161   : > { %930 = vmatprep.subr.bf16.mxu0 %v1701_v23  ;;  %970 = vmatpush1.bf16.msra.mxu1 %v1718_v28  ;;  %v510_v5 = vpack.c.bf16 %v508_v1, %v508_v1  ;;  %v592_v14 = vsub.s32 3, %v579_v8  ;;  %v588_v24 = vsub.s32 2, %v579_v8 }
 0x162   : > { %971 = vmatprep.subr.bf16.mxu1 %v1721_v29  ;;  %v581_v12 = vrot.slane %v576_v10, %v580_v9  ;;  %v585_v13 = vrot.slane %v576_v10, %v584_v11 }
 0x163   : > { %v593_v22 = vrot.slane %v576_v10, %v592_v14  ;;  %v589_v29 = vrot.slane %v576_v10, %v588_v24 }
 0x164   : > { %931 = vmatpush1.bf16.msra.mxu0 %v1705_v26 }
 0x165   : > { %932 = vmatprep.subr.bf16.mxu0 %v1707_v27  ;;  %972 = vmatpush1.bf16.msra.mxu1 %v1724_v32 }
 0x166   : > { %973 = vmatprep.subr.bf16.mxu1 %v1727_v33 }
 0x168   : > { %933 = vmatpush1.bf16.msra.mxu0 %v1711_v30 }
 0x169   : > { %934 = vmatprep.subr.bf16.mxu0 %v1713_v31  ;;  %974 = vmatpush1.bf16.msra.mxu1 %v1730_v36 }
 0x16a   : > { %975 = vmatprep.subr.bf16.mxu1 %v1733_v37 }
 0x16c   : > { %935 = vmatpush1.bf16.msra.mxu0 %v1717_v34 }
 0x16d   : > { %936 = vmatprep.subr.bf16.mxu0 %v1719_v35  ;;  %976 = vmatpush1.bf16.msra.mxu1 %v1736_v40 }
 0x16e   : > { %977 = vmatprep.subr.bf16.mxu1 %v1739_v41 }
 0x170   : > { %937 = vmatpush1.bf16.msra.mxu0 %v1723_v38 }
 0x171   : > { %938 = vmatprep.subr.bf16.mxu0 %v1725_v39  ;;  %978 = vmatpush1.bf16.msra.mxu1 %v1742_v46  ;;  %v1019_v39 = vld [vmem:[%s2768_s3] sm:$0xff] }
 0x172   : > { %979 = vmatprep.subr.bf16.mxu1 %v1745_v47 }
 0x174   : > { %939 = vmatpush1.bf16.msra.mxu0 %v1729_v43 }
 0x175   : > { %940 = vmatprep.subr.bf16.mxu0 %v1731_v45  ;;  %980 = vmatpush1.bf16.msra.mxu1 %v1748_v50 }
 0x176   : > { %981 = vmatprep.subr.bf16.mxu1 %v1751_v51 }
 0x178   : > { %941 = vmatpush1.bf16.msra.mxu0 %v1735_v48 }
 0x179   : > { %942 = vmatprep.subr.bf16.mxu0 %v1737_v49  ;;  %982 = vmatpush1.bf16.msra.mxu1 %v1754_v54 }
 0x17a   : > { %983 = vmatprep.subr.bf16.mxu1 %v1757_v55 }
 0x17c   : > { %943 = vmatpush1.bf16.msra.mxu0 %v1741_v52 }
 0x17d   : > { %944 = vmatprep.subr.bf16.mxu0 %v1743_v53  ;;  %984 = vmatpush1.bf16.msra.mxu1 %v1760_v58 }
 0x17e   : > { %985 = vmatprep.subr.bf16.mxu1 %v1761_v59 }
 0x180   : > { %945 = vmatpush1.bf16.msra.mxu0 %v1747_v56 }
 0x181   : > { %946 = vmatprep.subr.bf16.mxu0 %v1749_v57  ;;  %986 = vmatpush1.bf16.msra.mxu1 %v1763_v63 }
 0x182   : > { %987 = vmatprep.subr.bf16.mxu1 %v1764_v0 }
 0x184   : > { %947 = vmatpush1.bf16.msra.mxu0 %v1753_v60 }
 0x185   : > { %948 = vmatprep.subr.bf16.mxu0 %v1755_v62  ;;  %988 = vmatpush1.bf16.msra.mxu1 %v1766_v3 }
 0x186   : > { %989 = vmatprep.subr.bf16.mxu1 %v1767_v4 }
 0x188   : > { %949 = vmatpush1.bf16.msra.mxu0 %v1759_v2 }
 0x189   : > { %990 = vmatpush1.bf16.msra.mxu1 %v1769_v6 }
 0x18b   : > { %951 = vmatmul.mubr.bf16.vlgmr.msra.gmra.mrb[0].mxu0 %v510_v5 }
 0x18c   : > { %992 = vmatmul.mubr.bf16.vlgmr.msra.gmra.mrb[0].mxu1 %v510_v5 }
 0x25e   : > { %v952_v15 = vpop.f32.mrb[0].mxu0 }
 0x25f   : > { %v953_v16 = vadd.f32 %v952_v15, %v581_v12  ;;  %v954_v17 = vpop.f32.mrb[1].mxu0  ;;  %v993_v25 = vpop.f32.mrb[0].mxu1 }
 0x260   : > { %v955_v18 = vadd.f32 %v954_v17, %v585_v13  ;;  %v956_v19 = vpop.f32.mrb[2].mxu0  ;;  %v995_v26 = vpop.f32.mrb[1].mxu1  ;;  %v994_v32 = vadd.f32 %v993_v25, %v589_v29 }
 0x261   : > { %v1537_v20 = vmul.f32 -1.442695, %v953_v16  ;;  %v957_v21 = vpop.f32.mrb[3].mxu0  ;;  %v996_v27 = vadd.f32 %v995_v26, %v593_v22  ;;  %v997_v28 = vpop.f32.mrb[2].mxu1 }
 0x262   : > { %v1538_v23 = vmul.f32 -1.442695, %v955_v18  ;;  %v998_v30 = vpop.f32.mrb[3].mxu1 }
 0x263   : > { %1770 = vpow2.f32 %v1537_v20  ;;  %v1539_v31 = vmul.f32 -1.442695, %v996_v27 }
 0x264   : > { %1772 = vpow2.f32 %v1538_v23 }
 0x265   : > { %1774 = vpow2.f32 %v1539_v31 }
 0x266   : > { %1776 = vtanh.f32 %v994_v32 }
 0x26d   : > { %v1771_v33 = vpop.eup %1770 }
 0x26e   : > { %v1773_v34 = vpop.eup %1772  ;;  %v1003_v35 = vadd.f32 1.0, %v1771_v33 }
 0x26f   : > { %v1009_v36 = vadd.f32 1.0, %v1773_v34  ;;  %v1775_v37 = vpop.eup %1774 }
 0x270   : > { %1778 = vrcp.f32 %v1003_v35  ;;  %v1777_v38 = vpop.eup %1776  ;;  %v1016_v41 = vadd.f32 1.0, %v1775_v37 }
 0x271   : > { %1780 = vrcp.f32 %v1009_v36 }
 0x272   : > { %1782 = vrcp.f32 %v1016_v41 }
 0x27a   : > { %v1779_v40 = vpop.eup %1778 }
 0x27b   : > { %v1781_v42 = vpop.eup %1780  ;;  %v1021_v43 = vmul.f32 %v1779_v40, %v1777_v38 }
 0x27c   : > { %v1020_v44 = vmul.f32 %v1781_v42, %v1019_v39  ;;  %v1783_v46 = vpop.eup %1782 }
 0x27e   : > { %v1022_v45 = vadd.f32 %v1021_v43, %v1020_v44 }
 0x280   : > { %1784 = vtanh.f32 %v1022_v45  ;;  %1026 = vst [vmem:[#allocation18] sm:$0xff] %v1022_v45 }
 0x28a   : > { %v1785_v47 = vpop.eup %1784 }
 0x28b   : > { %v1024_v48 = vmul.f32 %v1785_v47, %v1783_v46 }
 0x28d   : > { %1025 = vst [vmem:[#allocation16] sm:$0xff] %v1024_v48  ;;  %v1027_v49 = vpack.c.bf16 %v1024_v48, %v1024_v48 }
 0x28f   : > { %1028 = vst [vmem:[#allocation3] sm:$0xf] %v1027_v49 }
 0x290 PF: > { %v1787_v50 = vld [vmem:[%s2515_s13 + $0x4] ss:$8 sps:$4 sm:$0xff]   ;;  %v1789_v51 = vld [vmem:[%s2515_s13] ss:$8 sps:$4 sm:$0xff]   ;;  %v2274_v52 = vmov 0   ;;  %v1051_v4 = vlaneseq  ;;  %s1556_s26 = sshll.u32 %s2365_s0, 8  ;;  %s2803_s16 = scalar_lea.vmem %s2772_s7, %s2810_s17 }
 0x291   : > { %1173 = vmatprep.mubr.bf16.mxu0 %v2274_v52  ;;  %1786 = vset.pattern.permute.xlu0 %v2274_v52  ;;  %v1790_v53 = vld [vmem:[%s2515_s13 + $0x14] ss:$8 sps:$4 sm:$0xff]   ;;  %v1792_v54 = vld [vmem:[%s2515_s13 + $0x10] ss:$8 sps:$4 sm:$0xff]   ;;  %v1793_v55 = vld [vmem:[%s2515_s13 + $0x24] ss:$8 sps:$4 sm:$0xff]  }
 0x292   : > { %1141 = vmatprep.subr.bf16.mxu0 %v1787_v50  ;;  %v1795_v56 = vld [vmem:[%s2515_s13 + $0x20] ss:$8 sps:$4 sm:$0xff]   ;;  %v1796_v57 = vld [vmem:[%s2515_s13 + $0x34] ss:$8 sps:$4 sm:$0xff]   ;;  %v1798_v58 = vld [vmem:[%s2515_s13 + $0x30] ss:$8 sps:$4 sm:$0xff]  }
 0x293   : > { %1142 = vmatpush1.bf16.msra.mxu0 %v1789_v51  ;;  %v1799_v59 = vld [vmem:[%s2515_s13 + $0x44] ss:$8 sps:$4 sm:$0xff]   ;;  %v1801_v60 = vld [vmem:[%s2515_s13 + $0x40] ss:$8 sps:$4 sm:$0xff]   ;;  %v1802_v61 = vld [vmem:[%s2515_s13 + $0x54] ss:$8 sps:$4 sm:$0xff]  }
 0x294   : > { %1143 = vmatprep.subr.bf16.mxu0 %v1790_v53  ;;  %v1804_v62 = vld [vmem:[%s2515_s13 + $0x50] ss:$8 sps:$4 sm:$0xff]   ;;  %v1805_v63 = vld [vmem:[%s2515_s13 + $0x64] ss:$8 sps:$4 sm:$0xff]   ;;  %v1807_v0 = vld [vmem:[%s2515_s13 + $0x60] ss:$8 sps:$4 sm:$0xff]  }
 0x295   : > { %v1808_v1 = vld [vmem:[%s2515_s13 + $0x74] ss:$8 sps:$4 sm:$0xff]   ;;  %v1810_v2 = vld [vmem:[%s2515_s13 + $0x70] ss:$8 sps:$4 sm:$0xff]   ;;  %v1052_v5 = vshrl.u32 %v1051_v4, 7  ;;  %s1183_s6 = sshra.s32 %s1556_s26, 7 }
 0x296   : > { %v1032_v3 = vld [vmem:[#allocation3] sm:$0xf]  ;;  %s1557_s29 = sshll.u32 %s1183_s6, 3  ;;  %v1189_v18 = vld [vmem:[#allocation4] sm:$0xff]  ;;  %vm1214_vm1 = vcmask 7168   ;;  %v1194_v32 = vld [vmem:[#allocation5] sm:$0xff] }
 0x297   : > { %1144 = vmatpush1.bf16.msra.mxu0 %v1792_v54  ;;  %v1053_v6 = vsub.s32 0, %v1052_v5  ;;  %v1049_v7 = vld [vmem:[%s2803_s16] sm:$0x3]  ;;  %v1057_v8 = vsub.s32 1, %v1052_v5  ;;  %s1186_s13 = scalar_lea.vmem [#allocation15], %s1557_s29  ;;  %p1558_p7 = scmp.ne.s32.totalorder %s2365_s0, 1 }
 0x298   : > { %1145 = vmatprep.subr.bf16.mxu0 %v1793_v55  ;;  %v2275_v37 = vmov (!%p1558_p7), 0  }
 0x299   : > { %v1054_v9 = vrot.slane %v1049_v7, %v1053_v6  ;;  %v1058_v10 = vrot.slane %v1049_v7, %v1057_v8 }
 0x29b   : > { %1146 = vmatpush1.bf16.msra.mxu0 %v1795_v56 }
 0x29c   : > { %1147 = vmatprep.subr.bf16.mxu0 %v1796_v57 }
 0x29f   : > { %1148 = vmatpush1.bf16.msra.mxu0 %v1798_v58 }
 0x2a0   : > { %1149 = vmatprep.subr.bf16.mxu0 %v1799_v59 }
 0x2a3   : > { %1150 = vmatpush1.bf16.msra.mxu0 %v1801_v60 }
 0x2a4   : > { %1151 = vmatprep.subr.bf16.mxu0 %v1802_v61 }
 0x2a7   : > { %1152 = vmatpush1.bf16.msra.mxu0 %v1804_v62 }
 0x2a8   : > { %1153 = vmatprep.subr.bf16.mxu0 %v1805_v63 }
 0x2ab   : > { %1154 = vmatpush1.bf16.msra.mxu0 %v1807_v0 }
 0x2ac   : > { %1155 = vmatprep.subr.bf16.mxu0 %v1808_v1 }
 0x2af   : > { %1156 = vmatpush1.bf16.msra.mxu0 %v1810_v2 }
 0x2b2   : > { %1174 = vmatmul.mubr.bf16.vlgmr.msra.gmra.mrb[0].mxu0 %v1032_v3 }
 0x385   : > { %v1175_v11 = vpop.f32.mrb[0].mxu0 }
 0x386   : > { %v1176_v12 = vadd.f32 %v1175_v11, %v1054_v9  ;;  %v1177_v13 = vpop.f32.mrb[1].mxu0 }
 0x387   : > { %v1178_v14 = vadd.f32 %v1177_v13, %v1058_v10  ;;  %v1179_v15 = vpop.f32.mrb[2].mxu0 }
 0x388   : > { %1187 = vst [vmem:[%s1186_s13] sm:$0xff] %v1176_v12  ;;  %v1180_v16 = vpop.f32.mrb[3].mxu0 }
 0x389   : > { %1188 = vst [vmem:[%s1186_s13 + $0x8] sm:$0xff] %v1178_v14  ;;  %v1190_v17 = vmax.f32 %v1176_v12, %v1178_v14 }
 0x38b   : > { %1191 = vmax.xlane.f32.xlu0 %v1190_v17 }
 0x390   : > { %v1226_v42 = vld [vmem:[#allocation15] sm:$0xff] (!%p1558_p7)  ;;  %v1227_v43 = vld [vmem:[#allocation15 + $0x8] sm:$0xff] (!%p1558_p7)  ;;  %v1228_v44 = vld [vmem:[#allocation15 + $0x10] sm:$0xff] (!%p1558_p7) }
 0x391   : > { %v1229_v45 = vld [vmem:[#allocation15 + $0x18] sm:$0xff] (!%p1558_p7) }
 0x418   : > { %v1192_v19 = vpop.xlane.xlu0 %1191 }
 0x419   : > { %v1193_v20 = vmax.f32 %v1189_v18, %v1192_v19 }
 0x41b   : > { %v1195_v21 = vsub.f32 %v1189_v18, %v1193_v20  ;;  %1216 = vst.msk [vmem:[#allocation4] sm:$0xff] %vm1214_vm1, %v1193_v20  ;;  %1201 = vperm.xlu0 %1786, %v1193_v20  }
 0x41d   : > { %v1196_v30 = vmul.f32 1.442695, %v1195_v21 }
 0x41f   : > { %1817 = vset.pattern.permute.xlu0 (!%p1558_p7), %v2275_v37 }
 0x422   : > { %v1221_v39 = vld [vmem:[#allocation4] sm:$0xff] (!%p1558_p7) }
 0x49a   : > { %v1202_v22 = vpop.permute.xlu0 %1201 }
 0x49b   : > { %v1204_v23 = vsub.f32 %v1176_v12, %v1202_v22  ;;  %v1205_v24 = vsub.f32 %v1178_v14, %v1202_v22 }
 0x49d   : > { %v1206_v25 = vmul.f32 1.442695, %v1204_v23  ;;  %v1208_v26 = vmul.f32 1.442695, %v1205_v24 }
 0x49f   : > { %1811 = vpow2.f32 %v1206_v25 }
 0x4a0   : > { %1813 = vpow2.f32 %v1208_v26 }
 0x4a1   : > { %1815 = vpow2.f32 %v1196_v30 }
 0x4a9   : > { %v1812_v27 = vpop.eup %1811 }
 0x4aa   : > { %v1814_v28 = vpop.eup %1813 }
 0x4ab   : > { %v1210_v29 = vadd.f32 %v1814_v28, %v1812_v27  ;;  %v1816_v31 = vpop.eup %1815 }
 0x4ac   : > { %v1198_v33 = vmul.f32 %v1816_v31, %v1194_v32 }
 0x4ad   : > { %1211 = vadd.xlane.f32.xlu1 %v1210_v29 }
 0x537   : > { %1220 = sbr.rel (%p1558_p7) target bundleno = 1496 (0x5d8), region = 96 }
 0x53a   : > { %v1212_v34 = vpop.xlane.xlu1 %1211 }
 0x53b   : > { %v1213_v35 = vadd.f32 %v1212_v34, %v1198_v33 }
 0x53d   : > { %1215 = vst.msk [vmem:[#allocation5] sm:$0xff] %vm1214_vm1, %v1213_v35 }
 0x544   : > { %v1222_v36 = vld [vmem:[#allocation5] sm:$0xff] }
 0x545   : > { %1818 = vlog2.f32 %v1222_v36 }
 0x54f   : > { %v1819_v38 = vpop.eup %1818 }
 0x550   : > { %v1224_v40 = vmul.f32 0.6931472, %v1819_v38 }
 0x552   : > { %v1225_v41 = vadd.f32 %v1224_v40, %v1221_v39 }
 0x554   : > { %1232 = vperm.xlu0 %1817, %v1225_v41  }
 0x5d3   : > { %v1233_v46 = vpop.permute.xlu0 %1232 }
 0x5d4   : > { %v1235_v47 = vsub.f32 %v1226_v42, %v1233_v46  ;;  %v1236_v48 = vsub.f32 %v1227_v43, %v1233_v46  ;;  %v1237_v49 = vsub.f32 %v1228_v44, %v1233_v46  ;;  %v1238_v50 = vsub.f32 %v1229_v45, %v1233_v46 }
 0x5d6   : > { %1239 = vst [vmem:[#allocation15] sm:$0xff] %v1235_v47  ;;  %1240 = vst [vmem:[#allocation15 + $0x8] sm:$0xff] %v1236_v48 }
 0x5d7   : > { %1241 = vst [vmem:[#allocation15 + $0x10] sm:$0xff] %v1237_v49  ;;  %1242 = vst [vmem:[#allocation15 + $0x18] sm:$0xff] %v1238_v50 }
 0x5d8 PF: > { %p1614_p10 = scmp.eq.s32.totalorder %s2365_s0, 1  ;;  %s2276_s17 = smov [#allocation16]  }
 0x5d9   : > { %s1261_s14 = sshll.u32 %s2276_s17, 4  ;;  %s2277_s2 = smov [#allocation15]   ;;  %s1262_s14 = int_to_ptr.vmem [resolvable:$true] %s1261_s14 }
 0x5da   : > { %s1250_s11 = sshll.u32 %s2277_s2, 4  ;;  %s2108_s19 = scalar_lea.vmem %s1262_s14, 128  ;;  %s1251_s11 = int_to_ptr.vmem [resolvable:$true] %s1250_s11 }
 0x5db   : > { %p2109_p0 = scmp.ne.s32.totalorder %s1262_s14, %s2108_s19  ;;  %p2115_p8 = scmp.lt.s32.totalorder %s1262_s14, %s1262_s14 }
 0x5dc   : > { %p2116_p12 = scmp.lt.s32.totalorder %s2108_s19, %s2108_s19 }
 0x5dd   : > { %p2110_p1 = pnand %p2109_p0, %p1614_p10 }
 0x5de   : > { %p2117_p13 = por %p2116_p12, %p2115_p8 }
 0x5df   : > { %p2111_p2 = pneg %p2110_p1 }
 0x5e1   : > { %p2118_p4 = pnand %p2117_p13, %p2111_p2 }
 0x5e3   : > { %2121 = shalt.err (!%p2118_p4)
}
 0x5e4   : > { %s2122_s27 = scalar_lea.hbm %s2774_s9, 128 }
 0x5e5   : > { %p2123_p11 = scmp.ne.s32.totalorder %s2774_s9, %s2122_s27  ;;  %p2128_p9 = scmp.lt.u32.totalorder %s2122_s27, %s2774_s9 }
 0x5e7   : > { %p2124_p3 = pnand %p2123_p11, %p1614_p10 }
 0x5e9   : > { %p2125_p6 = pneg %p2124_p3 }
 0x5eb   : > { %p2130_p5 = pnand %p2128_p9, %p2125_p6 }
 0x5ed   : > { %2133 = shalt.err (!%p2130_p5)
}
 0x5ee   : > { %1589 = dma.vmem_to_hbm [thread:$0]  (%p1614_p10), %s1262_s14, 128, %s2774_s9, [#allocation17]  }
 0x5ef   : > { %s2134_s26 = scalar_lea.vmem %s1251_s11, 512  ;;  %p2141_p2 = scmp.lt.s32.totalorder %s1251_s11, %s1251_s11 }
 0x5f0   : > { %p2135_p7 = scmp.ne.s32.totalorder %s1251_s11, %s2134_s26  ;;  %p2142_p8 = scmp.lt.s32.totalorder %s2134_s26, %s2134_s26 }
 0x5f2   : > { %p2136_p0 = pnand %p2135_p7, %p1614_p10  ;;  %p2143_p12 = por %p2142_p8, %p2141_p2 }
 0x5f4   : > { %p2137_p1 = pneg %p2136_p0 }
 0x5f6   : > { %p2144_p13 = pnand %p2143_p12, %p2137_p1 }
 0x5f8   : > { %2147 = shalt.err (!%p2144_p13)
}
 0x5f9   : > { %s2148_s16 = scalar_lea.hbm %s2773_s8, 512 }
 0x5fa   : > { %p2149_p4 = scmp.ne.s32.totalorder %s2773_s8, %s2148_s16  ;;  %p2154_p6 = scmp.lt.u32.totalorder %s2148_s16, %s2773_s8 }
 0x5fc   : > { %p2150_p11 = pnand %p2149_p4, %p1614_p10 }
 0x5fe   : > { %p2151_p3 = pneg %p2150_p11 }
 0x600   : > { %p2156_p9 = pnand %p2154_p6, %p2151_p3 }
 0x602   : > { %2159 = shalt.err (!%p2156_p9)
}
 0x603   : > { %1587 = dma.vmem_to_hbm [thread:$0]  (%p1614_p10), %s1251_s11, 512, %s2773_s8, [#allocation11]  }
 0x604   : > { %s2278_s19 = smov [#allocation18]  }
 0x605   : > { %s1272_s12 = sshll.u32 %s2278_s19, 4  ;;  %s1273_s12 = int_to_ptr.vmem [resolvable:$true] %s1272_s12 }
 0x606   : > { %s2160_s21 = scalar_lea.vmem %s1273_s12, 128  ;;  %p2167_p1 = scmp.lt.s32.totalorder %s1273_s12, %s1273_s12 }
 0x607   : > { %p2161_p5 = scmp.ne.s32.totalorder %s1273_s12, %s2160_s21  ;;  %p2168_p2 = scmp.lt.s32.totalorder %s2160_s21, %s2160_s21 }
 0x609   : > { %p2162_p7 = pnand %p2161_p5, %p1614_p10  ;;  %p2169_p8 = por %p2168_p2, %p2167_p1 }
 0x60b   : > { %p2163_p0 = pneg %p2162_p7 }
 0x60d   : > { %p2170_p12 = pnand %p2169_p8, %p2163_p0 }
 0x60f   : > { %2173 = shalt.err (!%p2170_p12)
}
 0x610   : > { %s2174_s22 = scalar_lea.hbm %s2775_s10, 128 }
 0x611   : > { %p2175_p13 = scmp.ne.s32.totalorder %s2775_s10, %s2174_s22  ;;  %p2180_p3 = scmp.lt.u32.totalorder %s2174_s22, %s2775_s10 }
 0x613   : > { %p2176_p4 = pnand %p2175_p13, %p1614_p10 }
 0x615   : > { %p2177_p11 = pneg %p2176_p4 }
 0x617   : > { %p2182_p6 = pnand %p2180_p3, %p2177_p11 }
 0x619   : > { %2185 = shalt.err (!%p2182_p6)
}
 0x61a   : > { %1591 = dma.vmem_to_hbm [thread:$0]  (%p1614_p10), %s1273_s12, 128, %s2775_s10, [#allocation17]  }
 0x61b   : > { %2233 = dma.done.wait (%p1614_p10), [#allocation11], 512  }
 0x61c   : > { %2235 = vsyncadd (%p1614_p10), [#allocation11], 4294966784 }
 0x61d   : > { %2237 = dma.done.wait (%p1614_p10), [#allocation17], 256  }
 0x61e   : > { %2239 = vsyncadd (%p1614_p10), [#allocation17], 4294967040 }
 0x61f PF: > { %s2804_s26 = sld [smem:[#allocation51_spill]]  ;;  %s2805_s15 = sld [smem:[#allocation52_spill]] }
 0x620   : > { %s2806_s23 = smov %s2246_s24  ;;  %s2807_s24 = smov %s2250_s25 }
 0x625   : > { %p26_p9 = scmp.ge.s32.totalorder %s2804_s26, 4   ;;  %s2808_s25 = smov %s2805_s15 }
 0x627   :  { %28 = sbr.rel (!%p26_p9) target bundleno = 18 (0x12), region = 177 }
 0x62e   :  { %1293 = vsyncpa [#allocation10], 1 }
 0x62f   :  { %1295 = vsyncpa [#allocation10 + $0x1], 1 }
 0x630   :  { %1296 = vsyncpa [#allocation13], 1 }
 0x631   :  { %1297 = vsyncpa [#allocation11], 1 }
 0x632   :  { %1299 = vsyncpa [#allocation11 + $0x1], 1 }
 0x633   :  { %1300 = vsyncpa [#allocation17], 1 }
 0x634   :  { %1301 = vsyncmov [#allocation6] }
 0x637   :  { %s1302_s0 = vpop.sfrf %1301 }
 0x638   :  { %p1567_p10 = scmp.ne.s32.totalorder %s1302_s0, 0 }
 0x63a   :  { %1306 = shalt.err (%p1567_p10)  }
 0x63b   :  { %1308 = vsyncmov [#allocation6 + $0x1] }
 0x63e   :  { %s1309_s4 = vpop.sfrf %1308 }
 0x63f   :  { %p1568_p5 = scmp.ne.s32.totalorder %s1309_s4, 0 }
 0x641   :  { %1313 = shalt.err (%p1568_p5)  }
 0x642   :  { %1315 = vsyncmov [#allocation6 + $0x2] }
 0x645   :  { %s1316_s16 = vpop.sfrf %1315 }
 0x646   :  { %p1569_p7 = scmp.ne.s32.totalorder %s1316_s16, 0 }
 0x648   :  { %1320 = shalt.err (%p1569_p7)  }
 0x649   :  { %1322 = vsyncmov [#allocation6 + $0x3] }
 0x64c   :  { %s1323_s6 = vpop.sfrf %1322 }
 0x64d   :  { %p1570_p0 = scmp.ne.s32.totalorder %s1323_s6, 0 }
 0x64f   :  { %1327 = shalt.err (%p1570_p0)  }
 0x650   :  { %1329 = vsyncmov [#allocation6 + $0x4] }
 0x653   :  { %s1330_s1 = vpop.sfrf %1329 }
 0x654   :  { %p1571_p1 = scmp.ne.s32.totalorder %s1330_s1, 0 }
 0x656   :  { %1334 = shalt.err (%p1571_p1)  }
 0x657   :  { %1336 = vsyncmov [#allocation6 + $0x5] }
 0x65a   :  { %s1337_s3 = vpop.sfrf %1336 }
 0x65b   :  { %p1572_p2 = scmp.ne.s32.totalorder %s1337_s3, 0 }
 0x65d   :  { %1341 = shalt.err (%p1572_p2)  }
 0x65e   :  { %1343 = vsyncmov [#allocation6 + $0x6] }
 0x661   :  { %s1344_s5 = vpop.sfrf %1343 }
 0x662   :  { %p1573_p8 = scmp.ne.s32.totalorder %s1344_s5, 0 }
 0x664   :  { %1348 = shalt.err (%p1573_p8)  }
 0x665   :  { %1350 = vsyncmov [#allocation6 + $0x7] }
 0x668   :  { %s1351_s7 = vpop.sfrf %1350 }
 0x669   :  { %p1574_p12 = scmp.ne.s32.totalorder %s1351_s7, 0 }
 0x66b   :  { %1355 = shalt.err (%p1574_p12)  }

</bundles_post_ra>
